<compile_context>
chip_gen: v5e
topology: v5e:2x2
jax: 0.10.0
libtpu: 0.0.40
codegen_flags: <defaults>
</compile_context>

<pallas_src>
import functools

import jax
import jax.numpy as jnp
from jax.experimental import pallas as pl
from jax.experimental.pallas import tpu as pltpu

# Max lanes per grid tile (sweepable). At 4096 lanes the per-tile VMEM working
# set is ~0.9 MiB (x2 for double buffering ~1.7 MiB), comfortably under the
# 16 MiB default scoped-VMEM limit on v5e and the tighter v7x per-core budget,
# so no vmem_limit_bytes override is needed.
MAX_TILE_LANES = 4096


def _marcher_kernel(colors_ref, dens_ref, dep_ref, out_ref, *, S, C, white_back):
    """One ray-tile: online exclusive-cumprod compositing, fully fused.

    colors_ref: (C*S, Nt)   dens_ref/dep_ref: (S, Nt)   out_ref: (C+S+2, Nt)
    All per-sample rows are loaded on demand (keeps vreg pressure low at large
    tiles), weights rows stream straight to the output slab, and the rgb /
    depth / weight-total reductions are accumulated inside the same unrolled
    loop (no (C, S-1, Nt) broadcast temporary, no sublane concatenate).
    """
    nt = out_ref.shape[-1]
    zero = jnp.zeros((1, nt), jnp.float32)

    T = jnp.ones((1, nt), jnp.float32)       # exclusive transmittance
    wtot = zero                              # sum of weights
    depth_num = zero                         # sum of weights * depths_mid
    rgb_acc = [zero for _ in range(C)]       # per-channel sum of weights * colors_mid

    # carried "previous sample" rows
    d_prev = dep_ref[pl.ds(0, 1), :]                         # (1, Nt)
    s_prev = dens_ref[pl.ds(0, 1), :]                        # (1, Nt)
    c_prev = [colors_ref[pl.ds(c * S, 1), :] for c in range(C)]

    d_min = d_prev
    d_max = d_prev

    for i in range(S - 1):
        d_cur = dep_ref[pl.ds(i + 1, 1), :]
        s_cur = dens_ref[pl.ds(i + 1, 1), :]

        delta = d_cur - d_prev
        depth_mid = (d_cur + d_prev) * 0.5
        dens_mid = (s_cur + s_prev) * 0.5

        # clamp_mode == 'softplus'
        sigma = jax.nn.softplus(dens_mid - 1.0)
        alpha = 1.0 - jnp.exp(-sigma * delta)                # (1, Nt)

        w = alpha * T                                        # weight for this segment
        T = T * (1.0 - alpha + 1e-10)                        # exclusive cumprod update

        out_ref[pl.ds(C + 1 + i, 1), :] = w                  # stream weights row out

        wtot = wtot + w
        depth_num = depth_num + w * depth_mid
        for c in range(C):
            c_cur = colors_ref[pl.ds(c * S + i + 1, 1), :]
            rgb_acc[c] = rgb_acc[c] + w * ((c_cur + c_prev[c]) * 0.5)
            c_prev[c] = c_cur

        d_min = jnp.minimum(d_min, d_cur)
        d_max = jnp.maximum(d_max, d_cur)
        d_prev = d_cur
        s_prev = s_cur

    # composite depth: nan -> +inf (clamped to [min, max] in the wrapper,
    # exactly reproducing torch.nan_to_num(inf) + clamp).
    comp_depth = depth_num / wtot
    comp_depth = jnp.where(jnp.isnan(comp_depth), jnp.inf, comp_depth)
    out_ref[pl.ds(C, 1), :] = comp_depth

    for c in range(C):
        rgb = rgb_acc[c]
        if white_back:
            rgb = rgb + 1.0 - wtot
        out_ref[pl.ds(c, 1), :] = rgb * 2.0 - 1.0

    # per-ray depth min/max (reduced to global scalars in the wrapper; avoids
    # an extra full-HBM read of `depths` for torch.min/torch.max).
    out_ref[pl.ds(C + S, 1), :] = d_min
    out_ref[pl.ds(C + S + 1, 1), :] = d_max


def mip_ray_marcher2(colors, densities, depths, rendering_options):
    assert rendering_options['clamp_mode'] == 'softplus', \
        'MipRayMarcher only supports `clamp_mode`=`softplus`!'
    white_back = bool(rendering_options.get('white_back', False))

    colors = colors.astype(jnp.float32)
    densities = densities.astype(jnp.float32)
    depths = depths.astype(jnp.float32)

    B, R, S, C = colors.shape
    N = B * R

    # Tile sizing: lane-dense tiles as large as practical (amortize per-step
    # overhead / get big contiguous DMAs), but keep >= 2 tiles so the
    # "parallel" grid axis can be sharded across both v7x TensorCores.
    chunks = -(-N // 128)                      # 128-lane chunks needed
    max_chunks = MAX_TILE_LANES // 128
    if chunks >= 2:
        n_tiles = max(2, -(-chunks // max_chunks))
    else:
        n_tiles = 1
    tile_chunks = -(-chunks // n_tiles)
    n_tile = tile_chunks * 128
    Npad = n_tiles * n_tile
    pad = Npad - N

    # TODO(synk): these transposes are full HBM relayout passes comparable to the
    # kernel's own traffic; produce/consume the lane-dense (rows, N) layout
    # directly upstream/downstream to eliminate them.
    colors_t = jnp.transpose(colors.reshape(N, S, C), (2, 1, 0)).reshape(C * S, N)
    dens_t = jnp.transpose(densities.reshape(N, S), (1, 0))
    dep_t = jnp.transpose(depths.reshape(N, S), (1, 0))
    if pad:
        colors_t = jnp.pad(colors_t, ((0, 0), (0, pad)))
        dens_t = jnp.pad(dens_t, ((0, 0), (0, pad)))
        dep_t = jnp.pad(dep_t, ((0, 0), (0, pad)))

    R_out = C + S + 2  # C rgb rows + 1 depth row + (S-1) weight rows + 2 min/max rows
    kernel = functools.partial(_marcher_kernel, S=S, C=C, white_back=white_back)

    slab = pl.pallas_call(
        kernel,
        out_shape=jax.ShapeDtypeStruct((R_out, Npad), jnp.float32),
        grid=(n_tiles,),
        in_specs=[
            pl.BlockSpec((C * S, n_tile), lambda i: (0, i)),   # colors
            pl.BlockSpec((S, n_tile), lambda i: (0, i)),       # densities
            pl.BlockSpec((S, n_tile), lambda i: (0, i)),       # depths
        ],
        out_specs=pl.BlockSpec((R_out, n_tile), lambda i: (0, i)),
        compiler_params=pltpu.CompilerParams(
            dimension_semantics=("parallel",)),
    )(colors_t, dens_t, dep_t)

    # Back to PyTorch-style output shapes (single transpose of the packed slab).
    slab_v = jnp.transpose(slab[:, :N], (1, 0))                # (N, R_out)
    composite_rgb = slab_v[:, :C].reshape(B, R, C)
    composite_depth = slab_v[:, C:C + 1].reshape(B, R, 1)
    weights = slab_v[:, C + 1:C + S].reshape(B, R, S - 1, 1)

    d_min = jnp.min(slab_v[:, C + S])
    d_max = jnp.max(slab_v[:, C + S + 1])
    composite_depth = jnp.clip(composite_depth, d_min, d_max)
    return composite_rgb, composite_depth, weights


def _reference(colors, densities, depths, rendering_options):
    # pure-JAX mirror of the PyTorch run_forward for verification
    deltas = depths[:, :, 1:] - depths[:, :, :-1]
    colors_mid = (colors[:, :, :-1] + colors[:, :, 1:]) / 2
    densities_mid = (densities[:, :, :-1] + densities[:, :, 1:]) / 2
    depths_mid = (depths[:, :, :-1] + depths[:, :, 1:]) / 2
    densities_mid = jax.nn.softplus(densities_mid - 1)
    density_delta = densities_mid * deltas
    alpha = 1 - jnp.exp(-density_delta)
    alpha_shifted = jnp.concatenate(
        [jnp.ones_like(alpha[:, :, :1]), 1 - alpha + 1e-10], axis=-2)
    weights = alpha * jnp.cumprod(alpha_shifted, axis=-2)[:, :, :-1]
    composite_rgb = jnp.sum(weights * colors_mid, axis=-2)
    weight_total = weights.sum(2)
    composite_depth = jnp.sum(weights * depths_mid, axis=-2) / weight_total
    composite_depth = jnp.where(jnp.isnan(composite_depth), jnp.inf, composite_depth)
    composite_depth = jnp.clip(composite_depth, jnp.min(depths), jnp.max(depths))
    if rendering_options.get('white_back', False):
        composite_rgb = composite_rgb + 1 - weight_total
    composite_rgb = composite_rgb * 2 - 1
    return composite_rgb, composite_depth, weights


if __name__ == "__main__":
    # MipRayMarcher2 has no learnable parameters (empty __init__), so nothing to init.
    key = jax.random.PRNGKey(0)
    k1, k2, k3 = jax.random.split(key, 3)

    B, R, S, C = 2, 96, 8, 3   # batch, rays, samples-per-ray, color channels
    colors = jax.random.uniform(k1, (B, R, S, C), jnp.float32)
    densities = jax.random.normal(k2, (B, R, S, 1), jnp.float32)
    # monotonically increasing depths per ray (as produced by the sampler)
    dsteps = jax.random.uniform(k3, (B, R, S, 1), jnp.float32, 0.05, 0.3)
    depths = 2.0 + jnp.cumsum(dsteps, axis=2)

    rendering_options = {'clamp_mode': 'softplus', 'white_back': False}

    rgb, depth, weights = mip_ray_marcher2(colors, densities, depths, rendering_options)
    jax.block_until_ready((rgb, depth, weights))

    rgb_r, depth_r, w_r = _reference(colors, densities, depths, rendering_options)
    assert rgb.shape == (B, R, C) and depth.shape == (B, R, 1) and weights.shape == (B, R, S - 1, 1)
    assert jnp.allclose(rgb, rgb_r, atol=1e-4, rtol=1e-4)
    assert jnp.allclose(depth, depth_r, atol=1e-4, rtol=1e-4)
    assert jnp.allclose(weights, w_r, atol=1e-5, rtol=1e-5)

    print("KERNEL_OK")
</pallas_src>

<mosaic_0001>
module attributes {stable_mosaic.version = 11 : i64} {
  func.func @_marcher_kernel(%arg0: i32, %arg1: memref<24x128xf32, #tpu.memory_space<vmem>>, %arg2: memref<8x128xf32, #tpu.memory_space<vmem>>, %arg3: memref<8x128xf32, #tpu.memory_space<vmem>>, %arg4: memref<13x128xf32, #tpu.memory_space<vmem>>) attributes {dimension_semantics = [#tpu.dimension_semantics<parallel>], iteration_bounds = array<i64: 2>, scalar_prefetch = 0 : i64, scratch_operands = 0 : i64, tpu.core_type = #tpu.core_type<tc>, window_params = [{transform_indices = @transform_0, window_bounds = array<i64: 24, 128>}, {transform_indices = @transform_1, window_bounds = array<i64: 8, 128>}, {transform_indices = @transform_2, window_bounds = array<i64: 8, 128>}, {transform_indices = @transform_3, window_bounds = array<i64: 13, 128>}]} {
    %cst = arith.constant 0.000000e+00 : f32
    %0 = vector.broadcast %cst : f32 to vector<1x128xf32>
    %cst_0 = arith.constant 1.000000e+00 : f32
    %1 = vector.broadcast %cst_0 : f32 to vector<1x128xf32>
    %c0 = arith.constant 0 : index
    %c0_1 = arith.constant 0 : index
    %2 = vector.load %arg3[%c0, %c0_1] : memref<8x128xf32, #tpu.memory_space<vmem>>, vector<1x128xf32>
    %c0_2 = arith.constant 0 : index
    %c0_3 = arith.constant 0 : index
    %3 = vector.load %arg2[%c0_2, %c0_3] : memref<8x128xf32, #tpu.memory_space<vmem>>, vector<1x128xf32>
    %c0_4 = arith.constant 0 : index
    %c0_5 = arith.constant 0 : index
    %4 = vector.load %arg1[%c0_4, %c0_5] : memref<24x128xf32, #tpu.memory_space<vmem>>, vector<1x128xf32>
    %c8 = arith.constant 8 : index
    %c0_6 = arith.constant 0 : index
    %5 = vector.load %arg1[%c8, %c0_6] : memref<24x128xf32, #tpu.memory_space<vmem>>, vector<1x128xf32>
    %c16 = arith.constant 16 : index
    %c0_7 = arith.constant 0 : index
    %6 = vector.load %arg1[%c16, %c0_7] : memref<24x128xf32, #tpu.memory_space<vmem>>, vector<1x128xf32>
    %c1 = arith.constant 1 : index
    %c0_8 = arith.constant 0 : index
    %7 = vector.load %arg3[%c1, %c0_8] : memref<8x128xf32, #tpu.memory_space<vmem>>, vector<1x128xf32>
    %c1_9 = arith.constant 1 : index
    %c0_10 = arith.constant 0 : index
    %8 = vector.load %arg2[%c1_9, %c0_10] : memref<8x128xf32, #tpu.memory_space<vmem>>, vector<1x128xf32>
    %9 = arith.subf %7, %2 : vector<1x128xf32>
    %10 = arith.addf %7, %2 : vector<1x128xf32>
    %cst_11 = arith.constant 5.000000e-01 : f32
    %11 = vector.broadcast %cst_11 : f32 to vector<1x128xf32>
    %12 = arith.mulf %10, %11 : vector<1x128xf32>
    %13 = arith.addf %8, %3 : vector<1x128xf32>
    %cst_12 = arith.constant 5.000000e-01 : f32
    %14 = vector.broadcast %cst_12 : f32 to vector<1x128xf32>
    %15 = arith.mulf %13, %14 : vector<1x128xf32>
    %cst_13 = arith.constant 1.000000e+00 : f32
    %16 = vector.broadcast %cst_13 : f32 to vector<1x128xf32>
    %17 = arith.subf %15, %16 : vector<1x128xf32>
    %cst_14 = arith.constant 0.000000e+00 : f32
    %18 = vector.broadcast %cst_14 : f32 to vector<1x128xf32>
    %19 = arith.maximumf %17, %18 : vector<1x128xf32>
    %20 = vector.broadcast %cst_14 : f32 to vector<1x128xf32>
    %21 = arith.subf %17, %20 : vector<1x128xf32>
    %22 = arith.cmpf one, %21, %21 : vector<1x128xf32>
    %23 = vector.broadcast %cst_14 : f32 to vector<1x128xf32>
    %24 = arith.addf %17, %23 : vector<1x128xf32>
    %25 = math.absf %21 : vector<1x128xf32>
    %cst_15 = arith.constant 0.000000e+00 : f32
    %26 = vector.broadcast %cst_15 : f32 to vector<1x128xf32>
    %27 = arith.subf %26, %25 : vector<1x128xf32>
    %28 = math.exp %27 : vector<1x128xf32>
    %29 = math.log1p %28 : vector<1x128xf32>
    %30 = arith.addf %19, %29 : vector<1x128xf32>
    %31 = arith.select %22, %24, %30 : vector<1x128xi1>, vector<1x128xf32>
    %cst_16 = arith.constant 0.000000e+00 : f32
    %32 = vector.broadcast %cst_16 : f32 to vector<1x128xf32>
    %33 = arith.subf %32, %31 : vector<1x128xf32>
    %34 = arith.mulf %33, %9 : vector<1x128xf32>
    %35 = math.exp %34 : vector<1x128xf32>
    %cst_17 = arith.constant 1.000000e+00 : f32
    %36 = vector.broadcast %cst_17 : f32 to vector<1x128xf32>
    %37 = arith.subf %36, %35 : vector<1x128xf32>
    %38 = arith.mulf %37, %1 : vector<1x128xf32>
    %cst_18 = arith.constant 1.000000e+00 : f32
    %39 = vector.broadcast %cst_18 : f32 to vector<1x128xf32>
    %40 = arith.subf %39, %37 : vector<1x128xf32>
    %cst_19 = arith.constant 1.000000e-10 : f32
    %41 = vector.broadcast %cst_19 : f32 to vector<1x128xf32>
    %42 = arith.addf %40, %41 : vector<1x128xf32>
    %43 = arith.mulf %1, %42 : vector<1x128xf32>
    %c4 = arith.constant 4 : index
    %c0_20 = arith.constant 0 : index
    %44 = vector.load %arg4[%c4, %c0_20] : memref<13x128xf32, #tpu.memory_space<vmem>>, vector<1x128xf32>
    tpu.vector_store %arg4[%c4, %c0_20], %38 {strides = array<i32>} : memref<13x128xf32, #tpu.memory_space<vmem>>, vector<1x128xf32>,
    %45 = arith.addf %0, %38 : vector<1x128xf32>
    %46 = arith.mulf %38, %12 : vector<1x128xf32>
    %47 = arith.addf %0, %46 : vector<1x128xf32>
    %c1_21 = arith.constant 1 : index
    %c0_22 = arith.constant 0 : index
    %48 = vector.load %arg1[%c1_21, %c0_22] : memref<24x128xf32, #tpu.memory_space<vmem>>, vector<1x128xf32>
    %49 = arith.addf %48, %4 : vector<1x128xf32>
    %cst_23 = arith.constant 5.000000e-01 : f32
    %50 = vector.broadcast %cst_23 : f32 to vector<1x128xf32>
    %51 = arith.mulf %49, %50 : vector<1x128xf32>
    %52 = arith.mulf %38, %51 : vector<1x128xf32>
    %53 = arith.addf %0, %52 : vector<1x128xf32>
    %c9 = arith.constant 9 : index
    %c0_24 = arith.constant 0 : index
    %54 = vector.load %arg1[%c9, %c0_24] : memref<24x128xf32, #tpu.memory_space<vmem>>, vector<1x128xf32>
    %55 = arith.addf %54, %5 : vector<1x128xf32>
    %cst_25 = arith.constant 5.000000e-01 : f32
    %56 = vector.broadcast %cst_25 : f32 to vector<1x128xf32>
    %57 = arith.mulf %55, %56 : vector<1x128xf32>
    %58 = arith.mulf %38, %57 : vector<1x128xf32>
    %59 = arith.addf %0, %58 : vector<1x128xf32>
    %c17 = arith.constant 17 : index
    %c0_26 = arith.constant 0 : index
    %60 = vector.load %arg1[%c17, %c0_26] : memref<24x128xf32, #tpu.memory_space<vmem>>, vector<1x128xf32>
    %61 = arith.addf %60, %6 : vector<1x128xf32>
    %cst_27 = arith.constant 5.000000e-01 : f32
    %62 = vector.broadcast %cst_27 : f32 to vector<1x128xf32>
    %63 = arith.mulf %61, %62 : vector<1x128xf32>
    %64 = arith.mulf %38, %63 : vector<1x128xf32>
    %65 = arith.addf %0, %64 : vector<1x128xf32>
    %66 = arith.minimumf %2, %7 : vector<1x128xf32>
    %67 = arith.maximumf %2, %7 : vector<1x128xf32>
    %c2 = arith.constant 2 : index
    %c0_28 = arith.constant 0 : index
    %68 = vector.load %arg3[%c2, %c0_28] : memref<8x128xf32, #tpu.memory_space<vmem>>, vector<1x128xf32>
    %c2_29 = arith.constant 2 : index
    %c0_30 = arith.constant 0 : index
    %69 = vector.load %arg2[%c2_29, %c0_30] : memref<8x128xf32, #tpu.memory_space<vmem>>, vector<1x128xf32>
    %70 = arith.subf %68, %7 : vector<1x128xf32>
    %71 = arith.addf %68, %7 : vector<1x128xf32>
    %cst_31 = arith.constant 5.000000e-01 : f32
    %72 = vector.broadcast %cst_31 : f32 to vector<1x128xf32>
    %73 = arith.mulf %71, %72 : vector<1x128xf32>
    %74 = arith.addf %69, %8 : vector<1x128xf32>
    %cst_32 = arith.constant 5.000000e-01 : f32
    %75 = vector.broadcast %cst_32 : f32 to vector<1x128xf32>
    %76 = arith.mulf %74, %75 : vector<1x128xf32>
    %cst_33 = arith.constant 1.000000e+00 : f32
    %77 = vector.broadcast %cst_33 : f32 to vector<1x128xf32>
    %78 = arith.subf %76, %77 : vector<1x128xf32>
    %cst_34 = arith.constant 0.000000e+00 : f32
    %79 = vector.broadcast %cst_34 : f32 to vector<1x128xf32>
    %80 = arith.maximumf %78, %79 : vector<1x128xf32>
    %81 = vector.broadcast %cst_34 : f32 to vector<1x128xf32>
    %82 = arith.subf %78, %81 : vector<1x128xf32>
    %83 = arith.cmpf one, %82, %82 : vector<1x128xf32>
    %84 = vector.broadcast %cst_34 : f32 to vector<1x128xf32>
    %85 = arith.addf %78, %84 : vector<1x128xf32>
    %86 = math.absf %82 : vector<1x128xf32>
    %cst_35 = arith.constant 0.000000e+00 : f32
    %87 = vector.broadcast %cst_35 : f32 to vector<1x128xf32>
    %88 = arith.subf %87, %86 : vector<1x128xf32>
    %89 = math.exp %88 : vector<1x128xf32>
    %90 = math.log1p %89 : vector<1x128xf32>
    %91 = arith.addf %80, %90 : vector<1x128xf32>
    %92 = arith.select %83, %85, %91 : vector<1x128xi1>, vector<1x128xf32>
    %cst_36 = arith.constant 0.000000e+00 : f32
    %93 = vector.broadcast %cst_36 : f32 to vector<1x128xf32>
    %94 = arith.subf %93, %92 : vector<1x128xf32>
    %95 = arith.mulf %94, %70 : vector<1x128xf32>
    %96 = math.exp %95 : vector<1x128xf32>
    %cst_37 = arith.constant 1.000000e+00 : f32
    %97 = vector.broadcast %cst_37 : f32 to vector<1x128xf32>
    %98 = arith.subf %97, %96 : vector<1x128xf32>
    %99 = arith.mulf %98, %43 : vector<1x128xf32>
    %cst_38 = arith.constant 1.000000e+00 : f32
    %100 = vector.broadcast %cst_38 : f32 to vector<1x128xf32>
    %101 = arith.subf %100, %98 : vector<1x128xf32>
    %cst_39 = arith.constant 1.000000e-10 : f32
    %102 = vector.broadcast %cst_39 : f32 to vector<1x128xf32>
    %103 = arith.addf %101, %102 : vector<1x128xf32>
    %104 = arith.mulf %43, %103 : vector<1x128xf32>
    %c5 = arith.constant 5 : index
    %c0_40 = arith.constant 0 : index
    %105 = vector.load %arg4[%c5, %c0_40] : memref<13x128xf32, #tpu.memory_space<vmem>>, vector<1x128xf32>
    tpu.vector_store %arg4[%c5, %c0_40], %99 {strides = array<i32>} : memref<13x128xf32, #tpu.memory_space<vmem>>, vector<1x128xf32>,
    %106 = arith.addf %45, %99 : vector<1x128xf32>
    %107 = arith.mulf %99, %73 : vector<1x128xf32>
    %108 = arith.addf %47, %107 : vector<1x128xf32>
    %c2_41 = arith.constant 2 : index
    %c0_42 = arith.constant 0 : index
    %109 = vector.load %arg1[%c2_41, %c0_42] : memref<24x128xf32, #tpu.memory_space<vmem>>, vector<1x128xf32>
    %110 = arith.addf %109, %48 : vector<1x128xf32>
    %cst_43 = arith.constant 5.000000e-01 : f32
    %111 = vector.broadcast %cst_43 : f32 to vector<1x128xf32>
    %112 = arith.mulf %110, %111 : vector<1x128xf32>
    %113 = arith.mulf %99, %112 : vector<1x128xf32>
    %114 = arith.addf %53, %113 : vector<1x128xf32>
    %c10 = arith.constant 10 : index
    %c0_44 = arith.constant 0 : index
    %115 = vector.load %arg1[%c10, %c0_44] : memref<24x128xf32, #tpu.memory_space<vmem>>, vector<1x128xf32>
    %116 = arith.addf %115, %54 : vector<1x128xf32>
    %cst_45 = arith.constant 5.000000e-01 : f32
    %117 = vector.broadcast %cst_45 : f32 to vector<1x128xf32>
    %118 = arith.mulf %116, %117 : vector<1x128xf32>
    %119 = arith.mulf %99, %118 : vector<1x128xf32>
    %120 = arith.addf %59, %119 : vector<1x128xf32>
    %c18 = arith.constant 18 : index
    %c0_46 = arith.constant 0 : index
    %121 = vector.load %arg1[%c18, %c0_46] : memref<24x128xf32, #tpu.memory_space<vmem>>, vector<1x128xf32>
    %122 = arith.addf %121, %60 : vector<1x128xf32>
    %cst_47 = arith.constant 5.000000e-01 : f32
    %123 = vector.broadcast %cst_47 : f32 to vector<1x128xf32>
    %124 = arith.mulf %122, %123 : vector<1x128xf32>
    %125 = arith.mulf %99, %124 : vector<1x128xf32>
    %126 = arith.addf %65, %125 : vector<1x128xf32>
    %127 = arith.minimumf %66, %68 : vector<1x128xf32>
    %128 = arith.maximumf %67, %68 : vector<1x128xf32>
    %c3 = arith.constant 3 : index
    %c0_48 = arith.constant 0 : index
    %129 = vector.load %arg3[%c3, %c0_48] : memref<8x128xf32, #tpu.memory_space<vmem>>, vector<1x128xf32>
    %c3_49 = arith.constant 3 : index
    %c0_50 = arith.constant 0 : index
    %130 = vector.load %arg2[%c3_49, %c0_50] : memref<8x128xf32, #tpu.memory_space<vmem>>, vector<1x128xf32>
    %131 = arith.subf %129, %68 : vector<1x128xf32>
    %132 = arith.addf %129, %68 : vector<1x128xf32>
    %cst_51 = arith.constant 5.000000e-01 : f32
    %133 = vector.broadcast %cst_51 : f32 to vector<1x128xf32>
    %134 = arith.mulf %132, %133 : vector<1x128xf32>
    %135 = arith.addf %130, %69 : vector<1x128xf32>
    %cst_52 = arith.constant 5.000000e-01 : f32
    %136 = vector.broadcast %cst_52 : f32 to vector<1x128xf32>
    %137 = arith.mulf %135, %136 : vector<1x128xf32>
    %cst_53 = arith.constant 1.000000e+00 : f32
    %138 = vector.broadcast %cst_53 : f32 to vector<1x128xf32>
    %139 = arith.subf %137, %138 : vector<1x128xf32>
    %cst_54 = arith.constant 0.000000e+00 : f32
    %140 = vector.broadcast %cst_54 : f32 to vector<1x128xf32>
    %141 = arith.maximumf %139, %140 : vector<1x128xf32>
    %142 = vector.broadcast %cst_54 : f32 to vector<1x128xf32>
    %143 = arith.subf %139, %142 : vector<1x128xf32>
    %144 = arith.cmpf one, %143, %143 : vector<1x128xf32>
    %145 = vector.broadcast %cst_54 : f32 to vector<1x128xf32>
    %146 = arith.addf %139, %145 : vector<1x128xf32>
    %147 = math.absf %143 : vector<1x128xf32>
    %cst_55 = arith.constant 0.000000e+00 : f32
    %148 = vector.broadcast %cst_55 : f32 to vector<1x128xf32>
    %149 = arith.subf %148, %147 : vector<1x128xf32>
    %150 = math.exp %149 : vector<1x128xf32>
    %151 = math.log1p %150 : vector<1x128xf32>
    %152 = arith.addf %141, %151 : vector<1x128xf32>
    %153 = arith.select %144, %146, %152 : vector<1x128xi1>, vector<1x128xf32>
    %cst_56 = arith.constant 0.000000e+00 : f32
    %154 = vector.broadcast %cst_56 : f32 to vector<1x128xf32>
    %155 = arith.subf %154, %153 : vector<1x128xf32>
    %156 = arith.mulf %155, %131 : vector<1x128xf32>
    %157 = math.exp %156 : vector<1x128xf32>
    %cst_57 = arith.constant 1.000000e+00 : f32
    %158 = vector.broadcast %cst_57 : f32 to vector<1x128xf32>
    %159 = arith.subf %158, %157 : vector<1x128xf32>
    %160 = arith.mulf %159, %104 : vector<1x128xf32>
    %cst_58 = arith.constant 1.000000e+00 : f32
    %161 = vector.broadcast %cst_58 : f32 to vector<1x128xf32>
    %162 = arith.subf %161, %159 : vector<1x128xf32>
    %cst_59 = arith.constant 1.000000e-10 : f32
    %163 = vector.broadcast %cst_59 : f32 to vector<1x128xf32>
    %164 = arith.addf %162, %163 : vector<1x128xf32>
    %165 = arith.mulf %104, %164 : vector<1x128xf32>
    %c6 = arith.constant 6 : index
    %c0_60 = arith.constant 0 : index
    %166 = vector.load %arg4[%c6, %c0_60] : memref<13x128xf32, #tpu.memory_space<vmem>>, vector<1x128xf32>
    tpu.vector_store %arg4[%c6, %c0_60], %160 {strides = array<i32>} : memref<13x128xf32, #tpu.memory_space<vmem>>, vector<1x128xf32>,
    %167 = arith.addf %106, %160 : vector<1x128xf32>
    %168 = arith.mulf %160, %134 : vector<1x128xf32>
    %169 = arith.addf %108, %168 : vector<1x128xf32>
    %c3_61 = arith.constant 3 : index
    %c0_62 = arith.constant 0 : index
    %170 = vector.load %arg1[%c3_61, %c0_62] : memref<24x128xf32, #tpu.memory_space<vmem>>, vector<1x128xf32>
    %171 = arith.addf %170, %109 : vector<1x128xf32>
    %cst_63 = arith.constant 5.000000e-01 : f32
    %172 = vector.broadcast %cst_63 : f32 to vector<1x128xf32>
    %173 = arith.mulf %171, %172 : vector<1x128xf32>
    %174 = arith.mulf %160, %173 : vector<1x128xf32>
    %175 = arith.addf %114, %174 : vector<1x128xf32>
    %c11 = arith.constant 11 : index
    %c0_64 = arith.constant 0 : index
    %176 = vector.load %arg1[%c11, %c0_64] : memref<24x128xf32, #tpu.memory_space<vmem>>, vector<1x128xf32>
    %177 = arith.addf %176, %115 : vector<1x128xf32>
    %cst_65 = arith.constant 5.000000e-01 : f32
    %178 = vector.broadcast %cst_65 : f32 to vector<1x128xf32>
    %179 = arith.mulf %177, %178 : vector<1x128xf32>
    %180 = arith.mulf %160, %179 : vector<1x128xf32>
    %181 = arith.addf %120, %180 : vector<1x128xf32>
    %c19 = arith.constant 19 : index
    %c0_66 = arith.constant 0 : index
    %182 = vector.load %arg1[%c19, %c0_66] : memref<24x128xf32, #tpu.memory_space<vmem>>, vector<1x128xf32>
    %183 = arith.addf %182, %121 : vector<1x128xf32>
    %cst_67 = arith.constant 5.000000e-01 : f32
    %184 = vector.broadcast %cst_67 : f32 to vector<1x128xf32>
    %185 = arith.mulf %183, %184 : vector<1x128xf32>
    %186 = arith.mulf %160, %185 : vector<1x128xf32>
    %187 = arith.addf %126, %186 : vector<1x128xf32>
    %188 = arith.minimumf %127, %129 : vector<1x128xf32>
    %189 = arith.maximumf %128, %129 : vector<1x128xf32>
    %c4_68 = arith.constant 4 : index
    %c0_69 = arith.constant 0 : index
    %190 = vector.load %arg3[%c4_68, %c0_69] : memref<8x128xf32, #tpu.memory_space<vmem>>, vector<1x128xf32>
    %c4_70 = arith.constant 4 : index
    %c0_71 = arith.constant 0 : index
    %191 = vector.load %arg2[%c4_70, %c0_71] : memref<8x128xf32, #tpu.memory_space<vmem>>, vector<1x128xf32>
    %192 = arith.subf %190, %129 : vector<1x128xf32>
    %193 = arith.addf %190, %129 : vector<1x128xf32>
    %cst_72 = arith.constant 5.000000e-01 : f32
    %194 = vector.broadcast %cst_72 : f32 to vector<1x128xf32>
    %195 = arith.mulf %193, %194 : vector<1x128xf32>
    %196 = arith.addf %191, %130 : vector<1x128xf32>
    %cst_73 = arith.constant 5.000000e-01 : f32
    %197 = vector.broadcast %cst_73 : f32 to vector<1x128xf32>
    %198 = arith.mulf %196, %197 : vector<1x128xf32>
    %cst_74 = arith.constant 1.000000e+00 : f32
    %199 = vector.broadcast %cst_74 : f32 to vector<1x128xf32>
    %200 = arith.subf %198, %199 : vector<1x128xf32>
    %cst_75 = arith.constant 0.000000e+00 : f32
    %201 = vector.broadcast %cst_75 : f32 to vector<1x128xf32>
    %202 = arith.maximumf %200, %201 : vector<1x128xf32>
    %203 = vector.broadcast %cst_75 : f32 to vector<1x128xf32>
    %204 = arith.subf %200, %203 : vector<1x128xf32>
    %205 = arith.cmpf one, %204, %204 : vector<1x128xf32>
    %206 = vector.broadcast %cst_75 : f32 to vector<1x128xf32>
    %207 = arith.addf %200, %206 : vector<1x128xf32>
    %208 = math.absf %204 : vector<1x128xf32>
    %cst_76 = arith.constant 0.000000e+00 : f32
    %209 = vector.broadcast %cst_76 : f32 to vector<1x128xf32>
    %210 = arith.subf %209, %208 : vector<1x128xf32>
    %211 = math.exp %210 : vector<1x128xf32>
    %212 = math.log1p %211 : vector<1x128xf32>
    %213 = arith.addf %202, %212 : vector<1x128xf32>
    %214 = arith.select %205, %207, %213 : vector<1x128xi1>, vector<1x128xf32>
    %cst_77 = arith.constant 0.000000e+00 : f32
    %215 = vector.broadcast %cst_77 : f32 to vector<1x128xf32>
    %216 = arith.subf %215, %214 : vector<1x128xf32>
    %217 = arith.mulf %216, %192 : vector<1x128xf32>
    %218 = math.exp %217 : vector<1x128xf32>
    %cst_78 = arith.constant 1.000000e+00 : f32
    %219 = vector.broadcast %cst_78 : f32 to vector<1x128xf32>
    %220 = arith.subf %219, %218 : vector<1x128xf32>
    %221 = arith.mulf %220, %165 : vector<1x128xf32>
    %cst_79 = arith.constant 1.000000e+00 : f32
    %222 = vector.broadcast %cst_79 : f32 to vector<1x128xf32>
    %223 = arith.subf %222, %220 : vector<1x128xf32>
    %cst_80 = arith.constant 1.000000e-10 : f32
    %224 = vector.broadcast %cst_80 : f32 to vector<1x128xf32>
    %225 = arith.addf %223, %224 : vector<1x128xf32>
    %226 = arith.mulf %165, %225 : vector<1x128xf32>
    %c7 = arith.constant 7 : index
    %c0_81 = arith.constant 0 : index
    %227 = vector.load %arg4[%c7, %c0_81] : memref<13x128xf32, #tpu.memory_space<vmem>>, vector<1x128xf32>
    tpu.vector_store %arg4[%c7, %c0_81], %221 {strides = array<i32>} : memref<13x128xf32, #tpu.memory_space<vmem>>, vector<1x128xf32>,
    %228 = arith.addf %167, %221 : vector<1x128xf32>
    %229 = arith.mulf %221, %195 : vector<1x128xf32>
    %230 = arith.addf %169, %229 : vector<1x128xf32>
    %c4_82 = arith.constant 4 : index
    %c0_83 = arith.constant 0 : index
    %231 = vector.load %arg1[%c4_82, %c0_83] : memref<24x128xf32, #tpu.memory_space<vmem>>, vector<1x128xf32>
    %232 = arith.addf %231, %170 : vector<1x128xf32>
    %cst_84 = arith.constant 5.000000e-01 : f32
    %233 = vector.broadcast %cst_84 : f32 to vector<1x128xf32>
    %234 = arith.mulf %232, %233 : vector<1x128xf32>
    %235 = arith.mulf %221, %234 : vector<1x128xf32>
    %236 = arith.addf %175, %235 : vector<1x128xf32>
    %c12 = arith.constant 12 : index
    %c0_85 = arith.constant 0 : index
    %237 = vector.load %arg1[%c12, %c0_85] : memref<24x128xf32, #tpu.memory_space<vmem>>, vector<1x128xf32>
    %238 = arith.addf %237, %176 : vector<1x128xf32>
    %cst_86 = arith.constant 5.000000e-01 : f32
    %239 = vector.broadcast %cst_86 : f32 to vector<1x128xf32>
    %240 = arith.mulf %238, %239 : vector<1x128xf32>
    %241 = arith.mulf %221, %240 : vector<1x128xf32>
    %242 = arith.addf %181, %241 : vector<1x128xf32>
    %c20 = arith.constant 20 : index
    %c0_87 = arith.constant 0 : index
    %243 = vector.load %arg1[%c20, %c0_87] : memref<24x128xf32, #tpu.memory_space<vmem>>, vector<1x128xf32>
    %244 = arith.addf %243, %182 : vector<1x128xf32>
    %cst_88 = arith.constant 5.000000e-01 : f32
    %245 = vector.broadcast %cst_88 : f32 to vector<1x128xf32>
    %246 = arith.mulf %244, %245 : vector<1x128xf32>
    %247 = arith.mulf %221, %246 : vector<1x128xf32>
    %248 = arith.addf %187, %247 : vector<1x128xf32>
    %249 = arith.minimumf %188, %190 : vector<1x128xf32>
    %250 = arith.maximumf %189, %190 : vector<1x128xf32>
    %c5_89 = arith.constant 5 : index
    %c0_90 = arith.constant 0 : index
    %251 = vector.load %arg3[%c5_89, %c0_90] : memref<8x128xf32, #tpu.memory_space<vmem>>, vector<1x128xf32>
    %c5_91 = arith.constant 5 : index
    %c0_92 = arith.constant 0 : index
    %252 = vector.load %arg2[%c5_91, %c0_92] : memref<8x128xf32, #tpu.memory_space<vmem>>, vector<1x128xf32>
    %253 = arith.subf %251, %190 : vector<1x128xf32>
    %254 = arith.addf %251, %190 : vector<1x128xf32>
    %cst_93 = arith.constant 5.000000e-01 : f32
    %255 = vector.broadcast %cst_93 : f32 to vector<1x128xf32>
    %256 = arith.mulf %254, %255 : vector<1x128xf32>
    %257 = arith.addf %252, %191 : vector<1x128xf32>
    %cst_94 = arith.constant 5.000000e-01 : f32
    %258 = vector.broadcast %cst_94 : f32 to vector<1x128xf32>
    %259 = arith.mulf %257, %258 : vector<1x128xf32>
    %cst_95 = arith.constant 1.000000e+00 : f32
    %260 = vector.broadcast %cst_95 : f32 to vector<1x128xf32>
    %261 = arith.subf %259, %260 : vector<1x128xf32>
    %cst_96 = arith.constant 0.000000e+00 : f32
    %262 = vector.broadcast %cst_96 : f32 to vector<1x128xf32>
    %263 = arith.maximumf %261, %262 : vector<1x128xf32>
    %264 = vector.broadcast %cst_96 : f32 to vector<1x128xf32>
    %265 = arith.subf %261, %264 : vector<1x128xf32>
    %266 = arith.cmpf one, %265, %265 : vector<1x128xf32>
    %267 = vector.broadcast %cst_96 : f32 to vector<1x128xf32>
    %268 = arith.addf %261, %267 : vector<1x128xf32>
    %269 = math.absf %265 : vector<1x128xf32>
    %cst_97 = arith.constant 0.000000e+00 : f32
    %270 = vector.broadcast %cst_97 : f32 to vector<1x128xf32>
    %271 = arith.subf %270, %269 : vector<1x128xf32>
    %272 = math.exp %271 : vector<1x128xf32>
    %273 = math.log1p %272 : vector<1x128xf32>
    %274 = arith.addf %263, %273 : vector<1x128xf32>
    %275 = arith.select %266, %268, %274 : vector<1x128xi1>, vector<1x128xf32>
    %cst_98 = arith.constant 0.000000e+00 : f32
    %276 = vector.broadcast %cst_98 : f32 to vector<1x128xf32>
    %277 = arith.subf %276, %275 : vector<1x128xf32>
    %278 = arith.mulf %277, %253 : vector<1x128xf32>
    %279 = math.exp %278 : vector<1x128xf32>
    %cst_99 = arith.constant 1.000000e+00 : f32
    %280 = vector.broadcast %cst_99 : f32 to vector<1x128xf32>
    %281 = arith.subf %280, %279 : vector<1x128xf32>
    %282 = arith.mulf %281, %226 : vector<1x128xf32>
    %cst_100 = arith.constant 1.000000e+00 : f32
    %283 = vector.broadcast %cst_100 : f32 to vector<1x128xf32>
    %284 = arith.subf %283, %281 : vector<1x128xf32>
    %cst_101 = arith.constant 1.000000e-10 : f32
    %285 = vector.broadcast %cst_101 : f32 to vector<1x128xf32>
    %286 = arith.addf %284, %285 : vector<1x128xf32>
    %287 = arith.mulf %226, %286 : vector<1x128xf32>
    %c8_102 = arith.constant 8 : index
    %c0_103 = arith.constant 0 : index
    %288 = vector.load %arg4[%c8_102, %c0_103] : memref<13x128xf32, #tpu.memory_space<vmem>>, vector<1x128xf32>
    tpu.vector_store %arg4[%c8_102, %c0_103], %282 {strides = array<i32>} : memref<13x128xf32, #tpu.memory_space<vmem>>, vector<1x128xf32>,
    %289 = arith.addf %228, %282 : vector<1x128xf32>
    %290 = arith.mulf %282, %256 : vector<1x128xf32>
    %291 = arith.addf %230, %290 : vector<1x128xf32>
    %c5_104 = arith.constant 5 : index
    %c0_105 = arith.constant 0 : index
    %292 = vector.load %arg1[%c5_104, %c0_105] : memref<24x128xf32, #tpu.memory_space<vmem>>, vector<1x128xf32>
    %293 = arith.addf %292, %231 : vector<1x128xf32>
    %cst_106 = arith.constant 5.000000e-01 : f32
    %294 = vector.broadcast %cst_106 : f32 to vector<1x128xf32>
    %295 = arith.mulf %293, %294 : vector<1x128xf32>
    %296 = arith.mulf %282, %295 : vector<1x128xf32>
    %297 = arith.addf %236, %296 : vector<1x128xf32>
    %c13 = arith.constant 13 : index
    %c0_107 = arith.constant 0 : index
    %298 = vector.load %arg1[%c13, %c0_107] : memref<24x128xf32, #tpu.memory_space<vmem>>, vector<1x128xf32>
    %299 = arith.addf %298, %237 : vector<1x128xf32>
    %cst_108 = arith.constant 5.000000e-01 : f32
    %300 = vector.broadcast %cst_108 : f32 to vector<1x128xf32>
    %301 = arith.mulf %299, %300 : vector<1x128xf32>
    %302 = arith.mulf %282, %301 : vector<1x128xf32>
    %303 = arith.addf %242, %302 : vector<1x128xf32>
    %c21 = arith.constant 21 : index
    %c0_109 = arith.constant 0 : index
    %304 = vector.load %arg1[%c21, %c0_109] : memref<24x128xf32, #tpu.memory_space<vmem>>, vector<1x128xf32>
    %305 = arith.addf %304, %243 : vector<1x128xf32>
    %cst_110 = arith.constant 5.000000e-01 : f32
    %306 = vector.broadcast %cst_110 : f32 to vector<1x128xf32>
    %307 = arith.mulf %305, %306 : vector<1x128xf32>
    %308 = arith.mulf %282, %307 : vector<1x128xf32>
    %309 = arith.addf %248, %308 : vector<1x128xf32>
    %310 = arith.minimumf %249, %251 : vector<1x128xf32>
    %311 = arith.maximumf %250, %251 : vector<1x128xf32>
    %c6_111 = arith.constant 6 : index
    %c0_112 = arith.constant 0 : index
    %312 = vector.load %arg3[%c6_111, %c0_112] : memref<8x128xf32, #tpu.memory_space<vmem>>, vector<1x128xf32>
    %c6_113 = arith.constant 6 : index
    %c0_114 = arith.constant 0 : index
    %313 = vector.load %arg2[%c6_113, %c0_114] : memref<8x128xf32, #tpu.memory_space<vmem>>, vector<1x128xf32>
    %314 = arith.subf %312, %251 : vector<1x128xf32>
    %315 = arith.addf %312, %251 : vector<1x128xf32>
    %cst_115 = arith.constant 5.000000e-01 : f32
    %316 = vector.broadcast %cst_115 : f32 to vector<1x128xf32>
    %317 = arith.mulf %315, %316 : vector<1x128xf32>
    %318 = arith.addf %313, %252 : vector<1x128xf32>
    %cst_116 = arith.constant 5.000000e-01 : f32
    %319 = vector.broadcast %cst_116 : f32 to vector<1x128xf32>
    %320 = arith.mulf %318, %319 : vector<1x128xf32>
    %cst_117 = arith.constant 1.000000e+00 : f32
    %321 = vector.broadcast %cst_117 : f32 to vector<1x128xf32>
    %322 = arith.subf %320, %321 : vector<1x128xf32>
    %cst_118 = arith.constant 0.000000e+00 : f32
    %323 = vector.broadcast %cst_118 : f32 to vector<1x128xf32>
    %324 = arith.maximumf %322, %323 : vector<1x128xf32>
    %325 = vector.broadcast %cst_118 : f32 to vector<1x128xf32>
    %326 = arith.subf %322, %325 : vector<1x128xf32>
    %327 = arith.cmpf one, %326, %326 : vector<1x128xf32>
    %328 = vector.broadcast %cst_118 : f32 to vector<1x128xf32>
    %329 = arith.addf %322, %328 : vector<1x128xf32>
    %330 = math.absf %326 : vector<1x128xf32>
    %cst_119 = arith.constant 0.000000e+00 : f32
    %331 = vector.broadcast %cst_119 : f32 to vector<1x128xf32>
    %332 = arith.subf %331, %330 : vector<1x128xf32>
    %333 = math.exp %332 : vector<1x128xf32>
    %334 = math.log1p %333 : vector<1x128xf32>
    %335 = arith.addf %324, %334 : vector<1x128xf32>
    %336 = arith.select %327, %329, %335 : vector<1x128xi1>, vector<1x128xf32>
    %cst_120 = arith.constant 0.000000e+00 : f32
    %337 = vector.broadcast %cst_120 : f32 to vector<1x128xf32>
    %338 = arith.subf %337, %336 : vector<1x128xf32>
    %339 = arith.mulf %338, %314 : vector<1x128xf32>
    %340 = math.exp %339 : vector<1x128xf32>
    %cst_121 = arith.constant 1.000000e+00 : f32
    %341 = vector.broadcast %cst_121 : f32 to vector<1x128xf32>
    %342 = arith.subf %341, %340 : vector<1x128xf32>
    %343 = arith.mulf %342, %287 : vector<1x128xf32>
    %cst_122 = arith.constant 1.000000e+00 : f32
    %344 = vector.broadcast %cst_122 : f32 to vector<1x128xf32>
    %345 = arith.subf %344, %342 : vector<1x128xf32>
    %cst_123 = arith.constant 1.000000e-10 : f32
    %346 = vector.broadcast %cst_123 : f32 to vector<1x128xf32>
    %347 = arith.addf %345, %346 : vector<1x128xf32>
    %348 = arith.mulf %287, %347 : vector<1x128xf32>
    %c9_124 = arith.constant 9 : index
    %c0_125 = arith.constant 0 : index
    %349 = vector.load %arg4[%c9_124, %c0_125] : memref<13x128xf32, #tpu.memory_space<vmem>>, vector<1x128xf32>
    tpu.vector_store %arg4[%c9_124, %c0_125], %343 {strides = array<i32>} : memref<13x128xf32, #tpu.memory_space<vmem>>, vector<1x128xf32>,
    %350 = arith.addf %289, %343 : vector<1x128xf32>
    %351 = arith.mulf %343, %317 : vector<1x128xf32>
    %352 = arith.addf %291, %351 : vector<1x128xf32>
    %c6_126 = arith.constant 6 : index
    %c0_127 = arith.constant 0 : index
    %353 = vector.load %arg1[%c6_126, %c0_127] : memref<24x128xf32, #tpu.memory_space<vmem>>, vector<1x128xf32>
    %354 = arith.addf %353, %292 : vector<1x128xf32>
    %cst_128 = arith.constant 5.000000e-01 : f32
    %355 = vector.broadcast %cst_128 : f32 to vector<1x128xf32>
    %356 = arith.mulf %354, %355 : vector<1x128xf32>
    %357 = arith.mulf %343, %356 : vector<1x128xf32>
    %358 = arith.addf %297, %357 : vector<1x128xf32>
    %c14 = arith.constant 14 : index
    %c0_129 = arith.constant 0 : index
    %359 = vector.load %arg1[%c14, %c0_129] : memref<24x128xf32, #tpu.memory_space<vmem>>, vector<1x128xf32>
    %360 = arith.addf %359, %298 : vector<1x128xf32>
    %cst_130 = arith.constant 5.000000e-01 : f32
    %361 = vector.broadcast %cst_130 : f32 to vector<1x128xf32>
    %362 = arith.mulf %360, %361 : vector<1x128xf32>
    %363 = arith.mulf %343, %362 : vector<1x128xf32>
    %364 = arith.addf %303, %363 : vector<1x128xf32>
    %c22 = arith.constant 22 : index
    %c0_131 = arith.constant 0 : index
    %365 = vector.load %arg1[%c22, %c0_131] : memref<24x128xf32, #tpu.memory_space<vmem>>, vector<1x128xf32>
    %366 = arith.addf %365, %304 : vector<1x128xf32>
    %cst_132 = arith.constant 5.000000e-01 : f32
    %367 = vector.broadcast %cst_132 : f32 to vector<1x128xf32>
    %368 = arith.mulf %366, %367 : vector<1x128xf32>
    %369 = arith.mulf %343, %368 : vector<1x128xf32>
    %370 = arith.addf %309, %369 : vector<1x128xf32>
    %371 = arith.minimumf %310, %312 : vector<1x128xf32>
    %372 = arith.maximumf %311, %312 : vector<1x128xf32>
    %c7_133 = arith.constant 7 : index
    %c0_134 = arith.constant 0 : index
    %373 = vector.load %arg3[%c7_133, %c0_134] : memref<8x128xf32, #tpu.memory_space<vmem>>, vector<1x128xf32>
    %c7_135 = arith.constant 7 : index
    %c0_136 = arith.constant 0 : index
    %374 = vector.load %arg2[%c7_135, %c0_136] : memref<8x128xf32, #tpu.memory_space<vmem>>, vector<1x128xf32>
    %375 = arith.subf %373, %312 : vector<1x128xf32>
    %376 = arith.addf %373, %312 : vector<1x128xf32>
    %cst_137 = arith.constant 5.000000e-01 : f32
    %377 = vector.broadcast %cst_137 : f32 to vector<1x128xf32>
    %378 = arith.mulf %376, %377 : vector<1x128xf32>
    %379 = arith.addf %374, %313 : vector<1x128xf32>
    %cst_138 = arith.constant 5.000000e-01 : f32
    %380 = vector.broadcast %cst_138 : f32 to vector<1x128xf32>
    %381 = arith.mulf %379, %380 : vector<1x128xf32>
    %cst_139 = arith.constant 1.000000e+00 : f32
    %382 = vector.broadcast %cst_139 : f32 to vector<1x128xf32>
    %383 = arith.subf %381, %382 : vector<1x128xf32>
    %cst_140 = arith.constant 0.000000e+00 : f32
    %384 = vector.broadcast %cst_140 : f32 to vector<1x128xf32>
    %385 = arith.maximumf %383, %384 : vector<1x128xf32>
    %386 = vector.broadcast %cst_140 : f32 to vector<1x128xf32>
    %387 = arith.subf %383, %386 : vector<1x128xf32>
    %388 = arith.cmpf one, %387, %387 : vector<1x128xf32>
    %389 = vector.broadcast %cst_140 : f32 to vector<1x128xf32>
    %390 = arith.addf %383, %389 : vector<1x128xf32>
    %391 = math.absf %387 : vector<1x128xf32>
    %cst_141 = arith.constant 0.000000e+00 : f32
    %392 = vector.broadcast %cst_141 : f32 to vector<1x128xf32>
    %393 = arith.subf %392, %391 : vector<1x128xf32>
    %394 = math.exp %393 : vector<1x128xf32>
    %395 = math.log1p %394 : vector<1x128xf32>
    %396 = arith.addf %385, %395 : vector<1x128xf32>
    %397 = arith.select %388, %390, %396 : vector<1x128xi1>, vector<1x128xf32>
    %cst_142 = arith.constant 0.000000e+00 : f32
    %398 = vector.broadcast %cst_142 : f32 to vector<1x128xf32>
    %399 = arith.subf %398, %397 : vector<1x128xf32>
    %400 = arith.mulf %399, %375 : vector<1x128xf32>
    %401 = math.exp %400 : vector<1x128xf32>
    %cst_143 = arith.constant 1.000000e+00 : f32
    %402 = vector.broadcast %cst_143 : f32 to vector<1x128xf32>
    %403 = arith.subf %402, %401 : vector<1x128xf32>
    %404 = arith.mulf %403, %348 : vector<1x128xf32>
    %c10_144 = arith.constant 10 : index
    %c0_145 = arith.constant 0 : index
    %405 = vector.load %arg4[%c10_144, %c0_145] : memref<13x128xf32, #tpu.memory_space<vmem>>, vector<1x128xf32>
    tpu.vector_store %arg4[%c10_144, %c0_145], %404 {strides = array<i32>} : memref<13x128xf32, #tpu.memory_space<vmem>>, vector<1x128xf32>,
    %406 = arith.addf %350, %404 : vector<1x128xf32>
    %407 = arith.mulf %404, %378 : vector<1x128xf32>
    %408 = arith.addf %352, %407 : vector<1x128xf32>
    %c7_146 = arith.constant 7 : index
    %c0_147 = arith.constant 0 : index
    %409 = vector.load %arg1[%c7_146, %c0_147] : memref<24x128xf32, #tpu.memory_space<vmem>>, vector<1x128xf32>
    %410 = arith.addf %409, %353 : vector<1x128xf32>
    %cst_148 = arith.constant 5.000000e-01 : f32
    %411 = vector.broadcast %cst_148 : f32 to vector<1x128xf32>
    %412 = arith.mulf %410, %411 : vector<1x128xf32>
    %413 = arith.mulf %404, %412 : vector<1x128xf32>
    %414 = arith.addf %358, %413 : vector<1x128xf32>
    %c15 = arith.constant 15 : index
    %c0_149 = arith.constant 0 : index
    %415 = vector.load %arg1[%c15, %c0_149] : memref<24x128xf32, #tpu.memory_space<vmem>>, vector<1x128xf32>
    %416 = arith.addf %415, %359 : vector<1x128xf32>
    %cst_150 = arith.constant 5.000000e-01 : f32
    %417 = vector.broadcast %cst_150 : f32 to vector<1x128xf32>
    %418 = arith.mulf %416, %417 : vector<1x128xf32>
    %419 = arith.mulf %404, %418 : vector<1x128xf32>
    %420 = arith.addf %364, %419 : vector<1x128xf32>
    %c23 = arith.constant 23 : index
    %c0_151 = arith.constant 0 : index
    %421 = vector.load %arg1[%c23, %c0_151] : memref<24x128xf32, #tpu.memory_space<vmem>>, vector<1x128xf32>
    %422 = arith.addf %421, %365 : vector<1x128xf32>
    %cst_152 = arith.constant 5.000000e-01 : f32
    %423 = vector.broadcast %cst_152 : f32 to vector<1x128xf32>
    %424 = arith.mulf %422, %423 : vector<1x128xf32>
    %425 = arith.mulf %404, %424 : vector<1x128xf32>
    %426 = arith.addf %370, %425 : vector<1x128xf32>
    %427 = arith.minimumf %371, %373 : vector<1x128xf32>
    %428 = arith.maximumf %372, %373 : vector<1x128xf32>
    %429 = arith.divf %408, %406 : vector<1x128xf32>
    %430 = arith.cmpf one, %429, %429 : vector<1x128xf32>
    %cst_153 = arith.constant 0x7F800000 : f32
    %431 = vector.broadcast %cst_153 : f32 to vector<1x128xf32>
    %432 = arith.select %430, %431, %429 : vector<1x128xi1>, vector<1x128xf32>
    %c3_154 = arith.constant 3 : index
    %c0_155 = arith.constant 0 : index
    %433 = vector.load %arg4[%c3_154, %c0_155] : memref<13x128xf32, #tpu.memory_space<vmem>>, vector<1x128xf32>
    tpu.vector_store %arg4[%c3_154, %c0_155], %432 {strides = array<i32>} : memref<13x128xf32, #tpu.memory_space<vmem>>, vector<1x128xf32>,
    %cst_156 = arith.constant 2.000000e+00 : f32
    %434 = vector.broadcast %cst_156 : f32 to vector<1x128xf32>
    %435 = arith.mulf %414, %434 : vector<1x128xf32>
    %cst_157 = arith.constant 1.000000e+00 : f32
    %436 = vector.broadcast %cst_157 : f32 to vector<1x128xf32>
    %437 = arith.subf %435, %436 : vector<1x128xf32>
    %c0_158 = arith.constant 0 : index
    %c0_159 = arith.constant 0 : index
    %438 = vector.load %arg4[%c0_158, %c0_159] : memref<13x128xf32, #tpu.memory_space<vmem>>, vector<1x128xf32>
    tpu.vector_store %arg4[%c0_158, %c0_159], %437 {strides = array<i32>} : memref<13x128xf32, #tpu.memory_space<vmem>>, vector<1x128xf32>,
    %cst_160 = arith.constant 2.000000e+00 : f32
    %439 = vector.broadcast %cst_160 : f32 to vector<1x128xf32>
    %440 = arith.mulf %420, %439 : vector<1x128xf32>
    %cst_161 = arith.constant 1.000000e+00 : f32
    %441 = vector.broadcast %cst_161 : f32 to vector<1x128xf32>
    %442 = arith.subf %440, %441 : vector<1x128xf32>
    %c1_162 = arith.constant 1 : index
    %c0_163 = arith.constant 0 : index
    %443 = vector.load %arg4[%c1_162, %c0_163] : memref<13x128xf32, #tpu.memory_space<vmem>>, vector<1x128xf32>
    tpu.vector_store %arg4[%c1_162, %c0_163], %442 {strides = array<i32>} : memref<13x128xf32, #tpu.memory_space<vmem>>, vector<1x128xf32>,
    %cst_164 = arith.constant 2.000000e+00 : f32
    %444 = vector.broadcast %cst_164 : f32 to vector<1x128xf32>
    %445 = arith.mulf %426, %444 : vector<1x128xf32>
    %cst_165 = arith.constant 1.000000e+00 : f32
    %446 = vector.broadcast %cst_165 : f32 to vector<1x128xf32>
    %447 = arith.subf %445, %446 : vector<1x128xf32>
    %c2_166 = arith.constant 2 : index
    %c0_167 = arith.constant 0 : index
    %448 = vector.load %arg4[%c2_166, %c0_167] : memref<13x128xf32, #tpu.memory_space<vmem>>, vector<1x128xf32>
    tpu.vector_store %arg4[%c2_166, %c0_167], %447 {strides = array<i32>} : memref<13x128xf32, #tpu.memory_space<vmem>>, vector<1x128xf32>,
    %c11_168 = arith.constant 11 : index
    %c0_169 = arith.constant 0 : index
    %449 = vector.load %arg4[%c11_168, %c0_169] : memref<13x128xf32, #tpu.memory_space<vmem>>, vector<1x128xf32>
    tpu.vector_store %arg4[%c11_168, %c0_169], %427 {strides = array<i32>} : memref<13x128xf32, #tpu.memory_space<vmem>>, vector<1x128xf32>,
    %c12_170 = arith.constant 12 : index
    %c0_171 = arith.constant 0 : index
    %450 = vector.load %arg4[%c12_170, %c0_171] : memref<13x128xf32, #tpu.memory_space<vmem>>, vector<1x128xf32>
    tpu.vector_store %arg4[%c12_170, %c0_171], %428 {strides = array<i32>} : memref<13x128xf32, #tpu.memory_space<vmem>>, vector<1x128xf32>,
    return
  }
  func.func @transform_0(%arg0: i32) -> (i32, i32) {
    %c0_i32 = arith.constant 0 : i32
    %c0_i32_0 = arith.constant 0 : i32
    return %c0_i32, %arg0 : i32, i32
  }
  func.func @transform_1(%arg0: i32) -> (i32, i32) {
    %c0_i32 = arith.constant 0 : i32
    %c0_i32_0 = arith.constant 0 : i32
    return %c0_i32, %arg0 : i32, i32
  }
  func.func @transform_2(%arg0: i32) -> (i32, i32) {
    %c0_i32 = arith.constant 0 : i32
    %c0_i32_0 = arith.constant 0 : i32
    return %c0_i32, %arg0 : i32, i32
  }
  func.func @transform_3(%arg0: i32) -> (i32, i32) {
    %c0_i32 = arith.constant 0 : i32
    %c0_i32_0 = arith.constant 0 : i32
    return %c0_i32, %arg0 : i32, i32
  }
}

</mosaic_0001>

<bundles_post_ra>
// kernel: tpu_custom_call.1
= control target key start
LH: loop header
LB: loop body
LE: loop exit
PB: predicated region body
PF: predicated region fallthrough
CT: control target
= control target key end

     0   :  { %s1675_s0 = inlined_call_operand.hbm [shape: f32[24,256], index: 0, kind: input, shape index: {}]   ;;  %s1676_s1 = inlined_call_operand.hbm [shape: f32[8,256], index: 1, kind: input, shape index: {}]   ;;  %s1677_s2 = inlined_call_operand.hbm [shape: f32[8,256], index: 2, kind: input, shape index: {}]   ;;  %s1678_s3 = inlined_call_operand.hbm [shape: f32[13,256], index: 3, kind: output, shape index: {}]  }
   0x1   :  { %1681 = sst [smem:[#allocation14_spill]] %s1675_s0 }
   0x2   :  { %1682 = sst [smem:[#allocation15_spill]] %s1676_s1 }
   0x3   :  { %8 = vsyncpa [#allocation3], 0 }
   0x4   :  { %10 = vsyncpa [#allocation3 + $0x1], 0 }
   0x5   :  { %11 = vsyncpa [#allocation6], 0 }
   0x6   :  { %13 = vsyncpa [#allocation6 + $0x1], 0 }
   0x7   :  { %14 = vsyncpa [#allocation4], 0 }
   0x8   :  { %16 = vsyncpa [#allocation4 + $0x1], 0  ;;  %s1139_s12 = smov 0   ;;  %s1141_s13 = smov 0  }
   0x9   :  { %s1143_s14 = smov 0   ;;  %s1145_s15 = smov 0  }
   0xa LB: > { %1683 = sst [smem:[#allocation12_spill]] %s1107_s14  ;;  %s1160_s16 = sadd.s32 4294967295, %s1111_s15   ;;  %s1111_s15 = sphi %s1145_s15, %s1713_s15   ;;  %s1107_s14 = sphi %s1143_s14, %s1710_s14   ;;  %s1103_s13 = sphi %s1141_s13, %s1712_s13   ;;  %s1099_s12 = sphi %s1139_s12, %s1711_s12  }
   0xb   : > { %s817_s17 = sadd.s32 4294967294, %s1111_s15   ;;  %s1164_s18 = sadd.s32 1, %s1111_s15  }
   0xc   : > { %s29_s19 = sadd.s32 1, %s1107_s14  ;;  %s26_s20 = ssub.s32 %s1111_s15, %s1164_s18 }
   0xd   : > { %p36_p0 = scmp.ne.s32.totalorder %s1107_s14, %s1103_s13  ;;  %p27_p1 = scmp.eq.s32.totalorder %s26_s20, 0 }
   0xe   : > { %p37_p2 = scmp.eq.s32.totalorder %s1111_s15, 0  ;;  %p42_p3 = scmp.ne.s32.totalorder %s1103_s13, %s1099_s12 }
   0xf   : > { %p43_p4 = scmp.eq.s32.totalorder %s1160_s16, 0  ;;  %p118_p7 = scmp.eq.s32.totalorder %s1160_s16, 1 }
  0x10   : > { %s1176_s21 = scalar_select %p27_p1, %s1107_s14, %s29_s19  }
  0x11   : > { %p38_p5 = por %p37_p2, %p36_p0  ;;  %p1178_p6 = por %p43_p4, %p42_p3 }
  0x12   : > { %1684 = sst [smem:[#allocation13_spill]] %s1176_s21  ;;  %p124_p8 = scmp.eq.s32.totalorder %s817_s17, 1 }
  0x13   : > { %p819_p9 = scmp.ge.s32.totalorder %s1111_s15, 2  ;;  %p867_p10 = scmp.lt.s32.totalorder %s1111_s15, 2 }
  0x14   : > { %p1185_p11 = por %p118_p7, %p36_p0  ;;  %p1189_p12 = por %p124_p8, %p42_p3 }
  0x15   : > { %s1194_s25 = sand.u32 1, %s1107_s14   ;;  %s1197_s26 = sshll.u32 %s1111_s15, 3 }
  0x16   : > { %s843_s27 = smul.u32 24, %s1194_s25  ;;  %s1688_s0 = sld [smem:[#allocation14_spill]] }
  0x17   : > { %p1204_p13 = pnand %p867_p10, %p38_p5  ;;  %s165_s8 = sand.u32 1, %s1111_s15  }
  0x18   : > { %s148_s6 = scalar_lea.vmem [#allocation2], %s843_s27  ;;  %s1679_s9 = sshll.u32 %s1194_s25, 3 }
  0x19   : > { %s155_s7 = sshll.u32 %s148_s6, 4  ;;  %s1690_s1 = sld [smem:[#allocation15_spill]]  ;;  %s1211_s7 = int_to_ptr.vmem [resolvable:$true] %s155_s7 }
  0x1a   : > { %s169_s19 = scalar_lea.vmem [#allocation5], %s1679_s9  ;;  %s1221_s29 = scalar_lea.sflag [#allocation6], %s165_s8 }
  0x1b   : > { %s177_s20 = sshll.u32 %s169_s19, 4  ;;  %p955_p1 = pneg %p1204_p13  ;;  %s178_s20 = int_to_ptr.vmem [resolvable:$true] %s177_s20 }
  0x1c   : > { %s152_s30 = scalar_lea.hbm %s1688_s0, %s1197_s26 }
  0x1d   : > { %s1208_s5 = sshll.u32 %s152_s30, 4  ;;  %s154_s5 = int_to_ptr.hbm [resolvable:$true] %s1208_s5 }
  0x1f   : > { %s173_s17 = scalar_lea.hbm %s1690_s1, %s1197_s26  ;;  %s958_s11 = scalar_lea.hbm %s1690_s1, 16 }
  0x20   : > { %s175_s28 = sshll.u32 %s173_s17, 4  ;;  %s176_s28 = int_to_ptr.hbm [resolvable:$true] %s175_s28 }
  0x21   : > { %s951_s27 = sshra.s32 %s176_s28, 4  ;;  %s952_s27 = int_to_ptr.hbm [resolvable:$true] %s951_s27 }
  0x22   : > { %s953_s30 = scalar_lea.hbm %s952_s27, 8  ;;  %p959_p4 = scmp.lt.s32.totalorder %s952_s27, %s1690_s1 }
  0x23   : > { %p954_p0 = scmp.ne.s32.totalorder %s952_s27, %s953_s30  ;;  %p960_p5 = scmp.lt.s32.totalorder %s958_s11, %s953_s30 }
  0x25   : > { %p956_p2 = pnand %p955_p1, %p954_p0  ;;  %p961_p7 = por %p960_p5, %p959_p4 }
  0x27   : > { %p957_p3 = pneg %p956_p2 }
  0x29   : > { %p962_p8 = pnand %p961_p7, %p957_p3 }
  0x2b   : > { %965 = shalt.err (!%p962_p8)
}
  0x2c   : > { %859 = dma.hbm_to_vmem [thread:$0]  (!%p1204_p13), %s176_s28, 128, %s178_s20, %s1221_s29  }
  0x2d   : > { %p825_p10 = scmp.ge.s32.totalorder %s1111_s15, 1  ;;  %p201_p0 = scmp.lt.s32.totalorder %s1111_s15, 3 }
  0x2e   : > { %s145_s27 = scalar_lea.sflag [#allocation3], %s1194_s25  ;;  %s981_s30 = sshra.s32 %s154_s5, 4  ;;  %s982_s30 = int_to_ptr.hbm [resolvable:$true] %s981_s30 }
  0x2f   : > { %p1239_p2 = pnand %p825_p10, %p201_p0  ;;  %s983_s6 = scalar_lea.hbm %s982_s30, 24 }
  0x30   : > { %p984_p3 = scmp.ne.s32.totalorder %s982_s30, %s983_s6  ;;  %s988_s20 = scalar_lea.hbm %s1688_s0, 48 }
  0x31   : > { %p989_p7 = scmp.lt.s32.totalorder %s982_s30, %s1688_s0  ;;  %p990_p8 = scmp.lt.s32.totalorder %s988_s20, %s983_s6 }
  0x32   : > { %p986_p4 = pnand %p984_p3, %p955_p1 }
  0x33   : > { %p991_p10 = por %p990_p8, %p989_p7 }
  0x34   : > { %p987_p5 = pneg %p986_p4 }
  0x36   : > { %p992_p0 = pnand %p991_p10, %p987_p5 }
  0x38   : > { %995 = shalt.err (!%p992_p0)
}
  0x39   : > { %s1113_s17 = smov 256   ;;  %s1114_s9 = smov 128  }
  0x3a   : > { %s1115_s1 = smov 8   ;;  %s192_s30 = scalar_lea.hbm %s1677_s2, %s1197_s26 }
  0x3b   : > { %856 = dma.hbm_to_vmem [thread:$0]  (!%p1204_p13), %s154_s5, 384, %s1211_s7, %s145_s27, %s1113_s17, %s1114_s9, %s1115_s1  }
  0x3c   : > { %s1692_s6 = sshll.u32 %s1194_s25, 3  ;;  %s194_s19 = sshll.u32 %s192_s30, 4  ;;  %s195_s19 = int_to_ptr.hbm [resolvable:$true] %s194_s19 }
  0x3d   : > { %s188_s20 = scalar_lea.vmem [#allocation7], %s1692_s6  ;;  %s1011_s0 = sshra.s32 %s195_s19, 4  ;;  %s1012_s0 = int_to_ptr.hbm [resolvable:$true] %s1011_s0 }
  0x3e   : > { %s196_s28 = sshll.u32 %s188_s20, 4  ;;  %s1013_s21 = scalar_lea.hbm %s1012_s0, 8  ;;  %s197_s28 = int_to_ptr.vmem [resolvable:$true] %s196_s28 }
  0x3f   : > { %p1014_p3 = scmp.ne.s32.totalorder %s1012_s0, %s1013_s21  ;;  %s1018_s5 = scalar_lea.hbm %s1677_s2, 16 }
  0x40   : > { %p1019_p7 = scmp.lt.s32.totalorder %s1012_s0, %s1677_s2  ;;  %p1020_p8 = scmp.lt.s32.totalorder %s1018_s5, %s1013_s21 }
  0x41   : > { %p1016_p4 = pnand %p1014_p3, %p955_p1 }
  0x42   : > { %p1021_p10 = por %p1020_p8, %p1019_p7 }
  0x43   : > { %p1017_p5 = pneg %p1016_p4 }
  0x45   : > { %p1022_p0 = pnand %p1021_p10, %p1017_p5 }
  0x47   : > { %1025 = shalt.err (!%p1022_p0)
}
  0x48   : > { %862 = dma.hbm_to_vmem [thread:$0]  (!%p1204_p13), %s195_s19, 128, %s197_s28, %s1221_s29  }
  0x49   : > { %205 = sbr.rel (%p1239_p2) target bundleno = 187 (0xbb), region = 32  ;;  %s1281_s25 = sand.u32 (!%p1239_p2), 1, %s1103_s13  }
  0x4a   : > { %s844_s14 = smul.u32 (!%p1239_p2), 24, %s1281_s25  ;;  %s208_s9 = scalar_lea.sflag (!%p1239_p2), [#allocation3], %s1281_s25 }
  0x4c   : > { %s1285_s0 = scalar_lea.vmem (!%p1239_p2), [#allocation2], %s844_s14 }
  0x4e   : > { %1086 = dma.done.wait (%p1178_p6), %s208_s9, 384  }
  0x4f   : > { %1088 = vsyncadd (%p1178_p6), %s208_s9, 4294966912  ;;  %s217_s21 = sand.u32 1, %s1160_s16   ;;  %s826_s4 = sshll.u32 %s1281_s25, 3 }
  0x50   : > { %s218_s29 = scalar_lea.sflag [#allocation6], %s217_s21  ;;  %s221_s8 = scalar_lea.vmem [#allocation5], %s826_s4 }
  0x51   : > { %1090 = dma.done.wait (%p1178_p6), %s218_s29, 256  }
  0x52   : > { %1092 = vsyncadd (%p1178_p6), %s218_s29, 4294967040  ;;  %v266_v0 = vld [vmem:[%s221_s8] sm:$0x1]  ;;  %v271_v1 = vld [vmem:[%s221_s8 + $0x1] sm:$0x1]  ;;  %s1317_s22 = scalar_lea.vmem [#allocation7], %s826_s4 }
  0x53   : > { %v325_v2 = vld [vmem:[%s221_s8 + $0x2] sm:$0x1]  ;;  %v381_v3 = vld [vmem:[%s221_s8 + $0x3] sm:$0x1]  ;;  %v275_v4 = vadd.f32 %v271_v1, %v266_v0  ;;  %v437_v7 = vld [vmem:[%s221_s8 + $0x4] sm:$0x1] }
  0x54   : > { %v329_v5 = vadd.f32 %v325_v2, %v271_v1  ;;  %v385_v6 = vadd.f32 %v381_v3, %v325_v2  ;;  %v493_v8 = vld [vmem:[%s221_s8 + $0x5] sm:$0x1]  ;;  %v549_v9 = vld [vmem:[%s221_s8 + $0x6] sm:$0x1]  ;;  %v441_v10 = vadd.f32 %v437_v7, %v381_v3  ;;  %v605_v26 = vld [vmem:[%s221_s8 + $0x7] sm:$0x1] }
  0x55   : > { %v497_v11 = vadd.f32 %v493_v8, %v437_v7  ;;  %v553_v12 = vadd.f32 %v549_v9, %v493_v8  ;;  %v276_v13 = vmul.f32 0.5, %v275_v4  ;;  %v609_v34 = vadd.f32 %v605_v26, %v549_v9  ;;  %v1320_v35 = vld [vmem:[%s1317_s22] sm:$0x1]  ;;  %v1323_v36 = vld [vmem:[%s1317_s22 + $0x1] sm:$0x1]  ;;  %s828_s27 = sshll.u32 %s1281_s25, 4 }
  0x56   : > { %v330_v14 = vmul.f32 0.5, %v329_v5  ;;  %v386_v15 = vmul.f32 0.5, %v385_v6  ;;  %v442_v16 = vmul.f32 0.5, %v441_v10  ;;  %v1327_v40 = vld [vmem:[%s1317_s22 + $0x2] sm:$0x1]  ;;  %v272_v51 = vsub.f32 %v1323_v36, %v1320_v35  ;;  %s1498_s17 = scalar_lea.vmem [#allocation8], %s828_s27 }
  0x57   : > { %v498_v17 = vmul.f32 0.5, %v497_v11  ;;  %v1299_v18 = vadd.f32 -1.0, %v276_v13  ;;  %v554_v22 = vmul.f32 0.5, %v553_v12  ;;  %v1330_v41 = vld [vmem:[%s1317_s22 + $0x3] sm:$0x1]  ;;  %v610_v47 = vmul.f32 0.5, %v609_v34 }
  0x58   : > { %v1301_v19 = vadd.f32 -1.0, %v330_v14  ;;  %v1303_v20 = vadd.f32 -1.0, %v386_v15  ;;  %v1305_v21 = vadd.f32 -1.0, %v442_v16  ;;  %v1334_v46 = vld [vmem:[%s1317_s22 + $0x4] sm:$0x1]  ;;  %v326_v52 = vsub.f32 %v1327_v40, %v1323_v36  ;;  %s840_s10 = sshll.u32 %s1160_s16, 3 }
  0x59   : > { %v281_v23 = vand.u32 2147483647, %v1299_v18  ;;  %v1309_v25 = vadd.f32 -1.0, %v498_v17  ;;  %v1313_v31 = vadd.f32 -1.0, %v554_v22  ;;  %v1337_v48 = vld [vmem:[%s1317_s22 + $0x5] sm:$0x1]  ;;  %v382_v53 = vsub.f32 %v1330_v41, %v1327_v40  ;;  %s697_s16 = scalar_lea.hbm %s1678_s3, %s840_s10 }
  0x5a   : > { %v335_v24 = vand.u32 2147483647, %v1301_v19  ;;  %v391_v28 = vand.u32 2147483647, %v1303_v20  ;;  %v447_v30 = vand.u32 2147483647, %v1305_v21  ;;  %v438_v61 = vsub.f32 %v1334_v46, %v1330_v41 }
  0x5b   : > { %v282_v27 = vsub.f32 0.0, %v281_v23  ;;  %v503_v39 = vand.u32 2147483647, %v1309_v25  ;;  %v559_v45 = vand.u32 2147483647, %v1313_v31  ;;  %v1345_v54 = vadd.f32 -1.0, %v610_v47 }
  0x5c   : > { %v336_v29 = vsub.f32 0.0, %v335_v24  ;;  %v392_v33 = vsub.f32 0.0, %v391_v28  ;;  %v448_v38 = vsub.f32 0.0, %v447_v30  ;;  %v278_v55 = vmax.f32 %v1299_v18, 0.0  ;;  %v1350_v57 = vld [vmem:[%s1317_s22 + $0x6] sm:$0x1] }
  0x5d   : > { %v283_v32 = vmul.f32 1.442695, %v282_v27  ;;  %v504_v44 = vsub.f32 0.0, %v503_v39  ;;  %v560_v50 = vsub.f32 0.0, %v559_v45  ;;  %v332_v56 = vmax.f32 %v1301_v19, 0.0  ;;  %s698_s6 = sshll.u32 %s1498_s17, 4  ;;  %s1638_s6 = int_to_ptr.vmem [resolvable:$true] %s698_s6 }
  0x5e   : > { %v337_v37 = vmul.f32 1.442695, %v336_v29  ;;  %v393_v42 = vmul.f32 1.442695, %v392_v33  ;;  %v449_v43 = vmul.f32 1.442695, %v448_v38  ;;  %v494_v63 = vsub.f32 %v1337_v48, %v1334_v46 }
  0x5f   : > { %907 = vpow2.f32 %v283_v32  ;;  %v505_v49 = vmul.f32 1.442695, %v504_v44  ;;  %v561_v58 = vmul.f32 1.442695, %v560_v50  ;;  %v388_v60 = vmax.f32 %v1303_v20, 0.0  ;;  %s700_s20 = sshll.u32 %s697_s16, 4  ;;  %s701_s20 = int_to_ptr.hbm [resolvable:$true] %s700_s20 }
  0x60   : > { %909 = vpow2.f32 %v337_v37  ;;  %v444_v62 = vmax.f32 %v1305_v21, 0.0  ;;  %v615_v3 = vand.u32 2147483647, %v1345_v54  ;;  %v500_v7 = vmax.f32 %v1309_v25, 0.0  ;;  %s687_s28 = scalar_lea.sflag [#allocation4], %s1281_s25  ;;  %s1055_s19 = sshra.s32 %s701_s20, 4  ;;  %s1056_s19 = int_to_ptr.hbm [resolvable:$true] %s1055_s19 }
  0x61   : > { %911 = vpow2.f32 %v393_v42  ;;  %v550_v8 = vsub.f32 %v1350_v57, %v1337_v48  ;;  %vm279_vm0 = vcmp.ne.f32.partialorder %v1299_v18, %v1299_v18  ;;  %vm333_vm1 = vcmp.ne.f32.partialorder %v1301_v19, %v1301_v19  ;;  %s1057_s1 = scalar_lea.hbm %s1056_s19, 16  ;;  %s1061_s26 = scalar_lea.hbm %s1678_s3, 32 }
  0x62   : > { %913 = vpow2.f32 %v449_v43  ;;  %v556_v22 = vmax.f32 %v1313_v31, 0.0  ;;  %v616_v23 = vsub.f32 0.0, %v615_v3  ;;  %vm389_vm2 = vcmp.ne.f32.partialorder %v1303_v20, %v1303_v20  ;;  %p1058_p6 = scmp.ne.s32.totalorder %s1056_s19, %s1057_s1  ;;  %p1062_p2 = scmp.lt.s32.totalorder %s1056_s19, %s1678_s3 }
  0x63   : > { %915 = vpow2.f32 %v505_v49  ;;  %vm445_vm5 = vcmp.ne.f32.partialorder %v1305_v21, %v1305_v21  ;;  %vm501_vm8 = vcmp.ne.f32.partialorder %v1309_v25, %v1309_v25  ;;  %vm557_vm11 = vcmp.ne.f32.partialorder %v1313_v31, %v1313_v31  ;;  %p1063_p3 = scmp.lt.s32.totalorder %s1061_s26, %s1057_s1 }
  0x64   : > { %917 = vpow2.f32 %v561_v58  ;;  %vm613_vm13 = vcmp.ne.f32.partialorder %v1345_v54, %v1345_v54  ;;  %p1059_p13 = pnand %p1058_p6, %p1185_p11 }
  0x65   : > { %v908_v59 = vpop.eup %907  ;;  %p1064_p4 = por %p1063_p3, %p1062_p2 }
  0x66   : > { %v910_v0 = vpop.eup %909  ;;  %v285_v1 = vadd.f32 1.0, %v908_v59  ;;  %v288_v2 = vmul.f32 -0.5, %v908_v59  ;;  %v291_v10 = vand.u32 2147483647, %v908_v59  ;;  %p1060_p1 = pneg %p1059_p13 }
  0x67   : > { %v912_v4 = vpop.eup %911  ;;  %v339_v5 = vadd.f32 1.0, %v910_v0  ;;  %v342_v6 = vmul.f32 -0.5, %v910_v0  ;;  %v345_v11 = vand.u32 2147483647, %v910_v0 }
  0x68   : > { %v914_v9 = vpop.eup %913  ;;  %919 = vlog2.f32 %v285_v1  ;;  %v395_v12 = vadd.f32 1.0, %v912_v4  ;;  %v289_v13 = vadd.f32 1.0, %v288_v2  ;;  %v398_v15 = vmul.f32 -0.5, %v912_v4  ;;  %p1065_p5 = pnand %p1064_p4, %p1060_p1 }
  0x69   : > { %921 = vlog2.f32 %v339_v5  ;;  %v343_v14 = vadd.f32 1.0, %v342_v6  ;;  %v916_v16 = vpop.eup %915  ;;  %v451_v17 = vadd.f32 1.0, %v914_v9  ;;  %v401_v26 = vand.u32 2147483647, %v912_v4 }
  0x6a   : > { %923 = vlog2.f32 %v395_v12  ;;  %v399_v24 = vadd.f32 1.0, %v398_v15  ;;  %v454_v27 = vmul.f32 -0.5, %v914_v9  ;;  %v457_v28 = vand.u32 2147483647, %v914_v9  ;;  %v918_v29 = vpop.eup %917 }
  0x6b   : > { %vm1369_vm3 = vcmp.lt.f32.partialorder %v291_v10, 0.0004427343  ;;  %925 = vlog2.f32 %v451_v17  ;;  %v507_v32 = vadd.f32 1.0, %v916_v16  ;;  %v510_v33 = vmul.f32 -0.5, %v916_v16 }
  0x6c   : > { %v290_v34 = vmul.f32 %v908_v59, %v289_v13  ;;  %v344_v37 = vmul.f32 %v910_v0, %v343_v14  ;;  %vm1373_vm4 = vcmp.lt.f32.partialorder %v345_v11, 0.0004427343  ;;  %v455_v39 = vadd.f32 1.0, %v454_v27  ;;  %v1456_v59 = vld [vmem:[%s1317_s22 + $0x7] sm:$0x1] }
  0x6d   : > { %927 = vlog2.f32 %v507_v32  ;;  %v511_v43 = vadd.f32 1.0, %v510_v33  ;;  %v563_v44 = vadd.f32 1.0, %v918_v29  ;;  %v566_v45 = vmul.f32 -0.5, %v918_v29 }
  0x6e   : > { %v920_v42 = vpop.eup %919  ;;  %v400_v50 = vmul.f32 %v912_v4, %v399_v24  ;;  %vm1379_vm6 = vcmp.lt.f32.partialorder %v401_v26, 0.0004427343  ;;  %vm1383_vm7 = vcmp.lt.f32.partialorder %v457_v28, 0.0004427343  ;;  %v513_v2 = vand.u32 2147483647, %v916_v16 }
  0x6f   : > { %v922_v47 = vpop.eup %921  ;;  %v287_v49 = vmul.f32 0.6931472, %v920_v42  ;;  %929 = vlog2.f32 %v563_v44  ;;  %v567_v3 = vadd.f32 1.0, %v566_v45  ;;  %v456_v6 = vmul.f32 %v914_v9, %v455_v39 }
  0x70   : > { %v924_v0 = vpop.eup %923  ;;  %v341_v1 = vmul.f32 0.6931472, %v922_v47  ;;  %v617_v10 = vmul.f32 1.442695, %v616_v23  ;;  %v512_v14 = vmul.f32 %v916_v16, %v511_v43  ;;  %v569_v15 = vand.u32 2147483647, %v918_v29 }
  0x71   : > { %v293_v5 = vsel %vm1369_vm3, %v290_v34, %v287_v49  ;;  %v397_v4 = vmul.f32 0.6931472, %v924_v0  ;;  %v926_v11 = vpop.eup %925  ;;  %vm1405_vm9 = vcmp.lt.f32.partialorder %v513_v2, 0.0004427343  ;;  %v568_v23 = vmul.f32 %v918_v29, %v567_v3  ;;  %v307_v16 = vld [vmem:[%s1285_s0 + $0x1] sm:$0x1] }
  0x72   : > { %v294_v12 = vadd.f32 %v293_v5, %v278_v55  ;;  %v347_v13 = vsel %vm1373_vm4, %v344_v37, %v341_v1  ;;  %v453_v26 = vmul.f32 0.6931472, %v926_v11  ;;  %931 = vpow2.f32 %v617_v10 }
  0x73   : > { %v348_v17 = vadd.f32 %v347_v13, %v332_v56  ;;  %v403_v24 = vsel %vm1379_vm6, %v400_v50, %v397_v4  ;;  %v928_v27 = vpop.eup %927  ;;  %vm1421_vm10 = vcmp.lt.f32.partialorder %v569_v15, 0.0004427343  ;;  %v273_v4 = vadd.f32 %v1323_v36, %v1320_v35 }
  0x74   : > { %v295_v9 = vsel %vm279_vm0, %v1299_v18, %v294_v12  ;;  %v404_v55 = vadd.f32 %v403_v24, %v388_v60  ;;  %v459_v30 = vsel %vm1383_vm7, %v456_v6, %v453_v26  ;;  %v509_v32 = vmul.f32 0.6931472, %v928_v27  ;;  %v267_v24 = vld [vmem:[%s1285_s0] sm:$0x1] }
  0x75   : > { %v296_v56 = vsub.f32 0.0, %v295_v9  ;;  %v349_v28 = vsel %vm333_vm1, %v1301_v19, %v348_v17  ;;  %v930_v33 = vpop.eup %929  ;;  %v460_v29 = vadd.f32 %v459_v30, %v444_v62  ;;  %v612_v10 = vmax.f32 %v1345_v54, 0.0 }
  0x76   : > { %v350_v18 = vsub.f32 0.0, %v349_v28  ;;  %v405_v60 = vsel %vm389_vm2, %v1303_v20, %v404_v55  ;;  %v515_v38 = vsel %vm1405_vm9, %v512_v14, %v509_v32  ;;  %v565_v39 = vmul.f32 0.6931472, %v930_v33  ;;  %v1494_v33 = vld [vmem:[%s1285_s0 + $0x3] sm:$0x1] }
  0x77   : > { %v297_v19 = vmul.f32 %v296_v56, %v272_v51  ;;  %v406_v37 = vsub.f32 0.0, %v405_v60  ;;  %v461_v62 = vsel %vm445_vm5, %v1305_v21, %v460_v29  ;;  %v516_v42 = vadd.f32 %v515_v38, %v500_v7 }
  0x78   : > { %v351_v20 = vmul.f32 %v350_v18, %v326_v52  ;;  %v932_v51 = vpop.eup %931  ;;  %v462_v45 = vsub.f32 0.0, %v461_v62  ;;  %v571_v52 = vsel %vm1421_vm10, %v568_v23, %v565_v39  ;;  %v383_v12 = vadd.f32 %v1330_v41, %v1327_v40  ;;  %v363_v23 = vld [vmem:[%s1285_s0 + $0x2] sm:$0x1] }
  0x79   : > { %v298_v43 = vmul.f32 1.442695, %v297_v19  ;;  %v407_v44 = vmul.f32 %v406_v37, %v382_v53  ;;  %v517_v21 = vsel %vm501_vm8, %v1309_v25, %v516_v42  ;;  %v572_v7 = vadd.f32 %v571_v52, %v556_v22 }
  0x7a   : > { %v352_v47 = vmul.f32 1.442695, %v351_v20  ;;  %v619_v49 = vadd.f32 1.0, %v932_v51  ;;  %v463_v53 = vmul.f32 %v462_v45, %v438_v61  ;;  %v518_v58 = vsub.f32 0.0, %v517_v21 }
  0x7b   : > { %933 = vpow2.f32 %v298_v43  ;;  %v408_v50 = vmul.f32 1.442695, %v407_v44  ;;  %v573_v25 = vsel %vm557_vm11, %v1313_v31, %v572_v7  ;;  %v622_v0 = vmul.f32 -0.5, %v932_v51 }
  0x7c   : > { %935 = vpow2.f32 %v352_v47  ;;  %v625_v1 = vand.u32 2147483647, %v932_v51  ;;  %v464_v22 = vmul.f32 1.442695, %v463_v53  ;;  %v519_v2 = vmul.f32 %v518_v58, %v494_v63 }
  0x7d   : > { %937 = vpow2.f32 %v408_v50  ;;  %v574_v3 = vsub.f32 0.0, %v573_v25  ;;  %v606_v61 = vsub.f32 %v1456_v59, %v1350_v57  ;;  %v623_v5 = vadd.f32 1.0, %v622_v0 }
  0x7e   : > { %939 = vlog2.f32 %v619_v49  ;;  %v520_v31 = vmul.f32 1.442695, %v519_v2  ;;  %v327_v63 = vadd.f32 %v1327_v40, %v1323_v36  ;;  %vm1476_vm12 = vcmp.lt.f32.partialorder %v625_v1, 0.0004427343 }
  0x7f   : > { %941 = vpow2.f32 %v464_v22  ;;  %v575_v6 = vmul.f32 %v574_v3, %v550_v8  ;;  %v439_v13 = vadd.f32 %v1334_v46, %v1330_v41  ;;  %v274_v15 = vmul.f32 0.5, %v273_v4 }
  0x80   : > { %943 = vpow2.f32 %v520_v31  ;;  %v495_v17 = vadd.f32 %v1337_v48, %v1334_v46  ;;  %v624_v9 = vmul.f32 %v932_v51, %v623_v5  ;;  %v328_v55 = vmul.f32 0.5, %v327_v63 }
  0x81   : > { %v934_v14 = vpop.eup %933  ;;  %v576_v8 = vmul.f32 1.442695, %v575_v6  ;;  %v384_v30 = vmul.f32 0.5, %v383_v12  ;;  %v440_v32 = vmul.f32 0.5, %v439_v13  ;;  %v551_v19 = vadd.f32 %v1350_v57, %v1337_v48 }
  0x82   : > { %v936_v26 = vpop.eup %935  ;;  %v1487_v27 = vsub.f32 1.0, %v934_v14  ;;  %v1503_v34 = vmul.f32 0.5, %v495_v17  ;;  %v308_v62 = vadd.f32 %v307_v16, %v267_v24  ;;  %v364_v44 = vadd.f32 %v363_v23, %v307_v16 }
  0x83   : > { %v938_v56 = vpop.eup %937  ;;  %v354_v28 = vsub.f32 1.0, %v936_v26  ;;  %945 = vpow2.f32 %v576_v8  ;;  %v420_v7 = vadd.f32 %v1494_v33, %v363_v23 }
  0x84   : > { %v940_v18 = vpop.eup %939  ;;  %303 = vst [vmem:[%s1498_s17 + $0x4] sm:$0x1] %v1487_v27  ;;  %v301_v60 = vsub.f32 1.0, %v1487_v27  ;;  %v410_v29 = vsub.f32 1.0, %v938_v56  ;;  %v305_v20 = vmul.f32 %v1487_v27, %v274_v15  ;;  %v309_v21 = vmul.f32 0.5, %v308_v62 }
  0x85   : > { %v942_v37 = vpop.eup %941  ;;  %v356_v38 = vsub.f32 1.0, %v354_v28  ;;  %v621_v39 = vmul.f32 0.6931472, %v940_v18  ;;  %v365_v2 = vmul.f32 0.5, %v364_v44 }
  0x86   : > { %v302_v42 = vadd.f32 1e-10, %v301_v60  ;;  %v412_v51 = vsub.f32 1.0, %v410_v29  ;;  %v466_v43 = vsub.f32 1.0, %v942_v37  ;;  %v944_v45 = vpop.eup %943  ;;  %v310_v22 = vmul.f32 %v309_v21, %v1487_v27 }
  0x87   : > { %v357_v52 = vadd.f32 1e-10, %v356_v38  ;;  %v627_v47 = vsel %vm1476_vm12, %v624_v9, %v621_v39  ;;  %v522_v58 = vsub.f32 1.0, %v944_v45  ;;  %v475_v9 = vld [vmem:[%s1285_s0 + $0x4] sm:$0x1]  ;;  %v421_v39 = vmul.f32 0.5, %v420_v7 }
  0x88   : > { %v1511_v49 = vmul.f32 %v354_v28, %v302_v42  ;;  %v413_v50 = vadd.f32 1e-10, %v412_v51  ;;  %v468_v53 = vsub.f32 1.0, %v466_v43  ;;  %v628_v1 = vadd.f32 %v627_v47, %v612_v10  ;;  %v368_v47 = vld [vmem:[%s1285_s0 + $0xa] sm:$0x1] }
  0x89   : > { %v946_v25 = vpop.eup %945  ;;  %v358_v0 = vmul.f32 %v357_v52, %v302_v42  ;;  %v524_v5 = vsub.f32 1.0, %v522_v58  ;;  %v552_v51 = vmul.f32 0.5, %v551_v19  ;;  %v312_v52 = vld [vmem:[%s1285_s0 + $0x9] sm:$0x1] }
  0x8a   : > { %359 = vst [vmem:[%s1498_s17 + $0x5] sm:$0x1] %v1511_v49  ;;  %v469_v3 = vadd.f32 1e-10, %v468_v53  ;;  %v578_v4 = vsub.f32 1.0, %v946_v25  ;;  %v360_v31 = vadd.f32 %v1511_v49, %v1487_v27  ;;  %v629_v10 = vsel %vm613_vm13, %v1345_v54, %v628_v1 }
  0x8b   : > { %v1518_v6 = vmul.f32 %v410_v29, %v358_v0  ;;  %v414_v63 = vmul.f32 %v413_v50, %v358_v0  ;;  %v361_v11 = vmul.f32 %v1511_v49, %v328_v55  ;;  %v525_v12 = vadd.f32 1e-10, %v524_v5  ;;  %v531_v29 = vld [vmem:[%s1285_s0 + $0x5] sm:$0x1]  ;;  %v424_v53 = vld [vmem:[%s1285_s0 + $0xb] sm:$0x1] }
  0x8c   : > { %v580_v13 = vsub.f32 1.0, %v578_v4  ;;  %v630_v14 = vsub.f32 0.0, %v629_v10  ;;  %v366_v8 = vmul.f32 %v365_v2, %v1511_v49  ;;  %v532_v7 = vadd.f32 %v531_v29, %v475_v9 }
  0x8d   : > { %415 = vst [vmem:[%s1498_s17 + $0x6] sm:$0x1] %v1518_v6  ;;  %v1528_v15 = vmul.f32 %v466_v43, %v414_v63  ;;  %v470_v17 = vmul.f32 %v469_v3, %v414_v63  ;;  %v362_v24 = vadd.f32 %v361_v11, %v305_v20  ;;  %v416_v26 = vadd.f32 %v1518_v6, %v360_v31  ;;  %v268_v20 = vld [vmem:[%s1285_s0 + $0x8] sm:$0x1]  ;;  %v640_v43 = vld [vmem:[%s1285_s0 + $0x7] sm:$0x1] }
  0x8e   : > { %v581_v54 = vadd.f32 1e-10, %v580_v13  ;;  %v631_v55 = vmul.f32 %v630_v14, %v606_v61  ;;  %v417_v16 = vmul.f32 %v1518_v6, %v384_v30  ;;  %v367_v23 = vadd.f32 %v366_v8, %v310_v22  ;;  %v587_v30 = vld [vmem:[%s1285_s0 + $0x6] sm:$0x1]  ;;  %v480_v22 = vld [vmem:[%s1285_s0 + $0xc] sm:$0x1] }
  0x8f   : > { %471 = vst [vmem:[%s1498_s17 + $0x7] sm:$0x1] %v1528_v15  ;;  %v1538_v56 = vmul.f32 %v522_v58, %v470_v17  ;;  %v526_v28 = vmul.f32 %v525_v12, %v470_v17  ;;  %v472_v18 = vadd.f32 %v1528_v15, %v416_v26  ;;  %v473_v60 = vmul.f32 %v1528_v15, %v440_v32  ;;  %v536_v31 = vld [vmem:[%s1285_s0 + $0xd] sm:$0x1]  ;;  %v592_v63 = vld [vmem:[%s1285_s0 + $0xe] sm:$0x1] }
  0x90   : > { %v632_v37 = vmul.f32 1.442695, %v631_v55  ;;  %v418_v38 = vadd.f32 %v417_v16, %v362_v24  ;;  %v476_v61 = vadd.f32 %v475_v9, %v1494_v33  ;;  %v607_v32 = vadd.f32 %v1456_v59, %v1350_v57  ;;  %v645_v16 = vld [vmem:[%s1285_s0 + $0xf] sm:$0x1] }
  0x91   : > { %527 = vst [vmem:[%s1498_s17 + $0x8] sm:$0x1] %v1538_v56  ;;  %v1548_v62 = vmul.f32 %v578_v4, %v526_v28  ;;  %v528_v42 = vadd.f32 %v1538_v56, %v472_v18  ;;  %v582_v44 = vmul.f32 %v581_v54, %v526_v28  ;;  %v422_v45 = vmul.f32 %v421_v39, %v1518_v6 }
  0x92   : > { %947 = vpow2.f32 %v632_v37  ;;  %v477_v33 = vmul.f32 0.5, %v476_v61  ;;  %v474_v21 = vadd.f32 %v473_v60, %v418_v38  ;;  %v529_v19 = vmul.f32 %v1538_v56, %v1503_v34  ;;  %v317_v37 = vld [vmem:[%s1285_s0 + $0x11] sm:$0x1] }
  0x93   : > { %583 = vst [vmem:[%s1498_s17 + $0x9] sm:$0x1] %v1548_v62  ;;  %v588_v50 = vadd.f32 %v587_v30, %v531_v29  ;;  %v584_v58 = vadd.f32 %v1548_v62, %v528_v42  ;;  %v423_v25 = vadd.f32 %v422_v45, %v367_v23  ;;  %v641_v1 = vadd.f32 %v640_v43, %v587_v30  ;;  %v269_v29 = vld [vmem:[%s1285_s0 + $0x10] sm:$0x1]  ;;  %v373_v45 = vld [vmem:[%s1285_s0 + $0x12] sm:$0x1] }
  0x94   : > { %v478_v0 = vmul.f32 %v477_v33, %v1528_v15  ;;  %v533_v2 = vmul.f32 0.5, %v532_v7  ;;  %v313_v5 = vadd.f32 %v312_v52, %v268_v20  ;;  %v369_v4 = vadd.f32 %v368_v47, %v312_v52  ;;  %v429_v33 = vld [vmem:[%s1285_s0 + $0x13] sm:$0x1] }
  0x95   : > { %v589_v3 = vmul.f32 0.5, %v588_v50  ;;  %v585_v10 = vmul.f32 %v1548_v62, %v552_v51  ;;  %v642_v11 = vmul.f32 0.5, %v641_v1  ;;  %v425_v12 = vadd.f32 %v424_v53, %v368_v47 }
  0x96   : > { %v479_v34 = vadd.f32 %v478_v0, %v423_v25  ;;  %v534_v13 = vmul.f32 %v533_v2, %v1538_v56  ;;  %v314_v8 = vmul.f32 0.5, %v313_v5  ;;  %v370_v17 = vmul.f32 0.5, %v369_v4 }
  0x97   : > { %v590_v14 = vmul.f32 %v589_v3, %v1548_v62  ;;  %v426_v26 = vmul.f32 0.5, %v425_v12  ;;  %v481_v9 = vadd.f32 %v480_v22, %v424_v53  ;;  %v537_v54 = vadd.f32 %v536_v31, %v480_v22  ;;  %v485_v3 = vld [vmem:[%s1285_s0 + $0x14] sm:$0x1] }
  0x98   : > { %v948_v24 = vpop.eup %947  ;;  %v593_v55 = vadd.f32 %v592_v63, %v536_v31  ;;  %v535_v28 = vadd.f32 %v534_v13, %v479_v34  ;;  %v315_v18 = vmul.f32 %v314_v8, %v1487_v27  ;;  %v371_v60 = vmul.f32 %v370_v17, %v1511_v49  ;;  %v541_v31 = vld [vmem:[%s1285_s0 + $0x15] sm:$0x1] }
  0x99   : > { %v634_v23 = vsub.f32 1.0, %v948_v24  ;;  %v530_v38 = vadd.f32 %v529_v19, %v474_v21  ;;  %v427_v39 = vmul.f32 %v426_v26, %v1518_v6  ;;  %v482_v61 = vmul.f32 0.5, %v481_v9 }
  0x9a   : > { %v538_v30 = vmul.f32 0.5, %v537_v54  ;;  %v372_v42 = vadd.f32 %v371_v60, %v315_v18  ;;  %v594_v51 = vmul.f32 0.5, %v593_v55  ;;  %v646_v43 = vadd.f32 %v645_v16, %v592_v63  ;;  %v597_v63 = vld [vmem:[%s1285_s0 + $0x16] sm:$0x1] }
  0x9b   : > { %v1576_v20 = vmul.f32 %v634_v23, %v582_v44  ;;  %v608_v52 = vmul.f32 0.5, %v607_v32  ;;  %v591_v47 = vadd.f32 %v590_v14, %v535_v28  ;;  %v483_v7 = vmul.f32 %v482_v61, %v1528_v15 }
  0x9c   : > { %v318_v50 = vadd.f32 %v317_v37, %v269_v29  ;;  %v428_v19 = vadd.f32 %v427_v39, %v372_v42  ;;  %v539_v53 = vmul.f32 %v538_v30, %v1538_v56  ;;  %v647_v25 = vmul.f32 0.5, %v646_v43 }
  0x9d   : > { %636 = vst [vmem:[%s1498_s17 + $0xa] sm:$0x1] %v1576_v20  ;;  %v1584_v21 = vadd.f32 %v1576_v20, %v584_v58  ;;  %v643_v44 = vmul.f32 %v642_v11, %v1576_v20  ;;  %v374_v32 = vadd.f32 %v373_v45, %v317_v37  ;;  %v430_v1 = vadd.f32 %v429_v33, %v373_v45 }
  0x9e   : > { %v319_v0 = vmul.f32 0.5, %v318_v50  ;;  %v586_v22 = vadd.f32 %v585_v10, %v530_v38  ;;  %v595_v2 = vmul.f32 %v594_v51, %v1548_v62  ;;  %v638_v58 = vmul.f32 %v1576_v20, %v608_v52  ;;  %v650_v10 = vld [vmem:[%s1285_s0 + $0x17] sm:$0x1] }
  0x9f   : > { %949 = vrcp.f32 %v1584_v21  ;;  %vm662_vm14 = vweird.f32 %v1584_v21  ;;  %v644_v5 = vadd.f32 %v643_v44, %v591_v47  ;;  %v484_v4 = vadd.f32 %v483_v7, %v428_v19 }
  0xa0   : > { %v666_v34 = vand.u32 2147483647, %v1584_v21  ;;  %v320_v11 = vmul.f32 %v319_v0, %v1487_v27  ;;  %v375_v12 = vmul.f32 0.5, %v374_v32  ;;  %v431_v13 = vmul.f32 0.5, %v430_v1 }
  0xa1   : > { %v675_v14 = vmul.f32 2.0, %v644_v5  ;;  %v540_v8 = vadd.f32 %v539_v53, %v484_v4  ;;  %v648_v17 = vmul.f32 %v647_v25, %v1576_v20  ;;  %v486_v24 = vadd.f32 %v485_v3, %v429_v33 }
  0xa2   : > { %v376_v26 = vmul.f32 %v375_v12, %v1511_v49  ;;  %v432_v9 = vmul.f32 %v431_v13, %v1518_v6  ;;  %v542_v54 = vadd.f32 %v541_v31, %v485_v3  ;;  %v598_v55 = vadd.f32 %v597_v63, %v541_v31 }
  0xa3   : > { %v836_v16 = vadd.f32 -1.0, %v675_v14  ;;  %v596_v23 = vadd.f32 %v595_v2, %v540_v8  ;;  %v487_v28 = vmul.f32 0.5, %v486_v24  ;;  %v651_v18 = vadd.f32 %v650_v10, %v597_v63 }
  0xa4   : > { %v377_v60 = vadd.f32 %v376_v26, %v320_v11  ;;  %v543_v29 = vmul.f32 0.5, %v542_v54  ;;  %v599_v37 = vmul.f32 0.5, %v598_v55  ;;  %v322_v38 = vmin.f32 %v1320_v35, %v1323_v36 }
  0xa5   : > { %v950_v27 = vpop.eup %949  ;;  %v668_v61 = vand.u32 2147483648, %v1584_v21  ;;  %677 = vst [vmem:[%s1498_s17] sm:$0x1] %v836_v16  ;;  %v649_v49 = vadd.f32 %v648_v17, %v596_v23  ;;  %v488_v6 = vmul.f32 %v487_v28, %v1528_v15  ;;  %v652_v51 = vmul.f32 0.5, %v651_v18 }
  0xa6   : > { %v658_v39 = vmul.f32 %v950_v27, %v1584_v21  ;;  %vm663_vm15 = vweird.f32 %v950_v27  ;;  %v433_v30 = vadd.f32 %v432_v9, %v377_v60  ;;  %v544_v42 = vmul.f32 %v543_v29, %v1538_v56 }
  0xa7   : > { %v678_v45 = vmul.f32 2.0, %v649_v49  ;;  %v378_v33 = vmin.f32 %v322_v38, %v1327_v40  ;;  %v323_v52 = vmax.f32 %v1320_v35, %v1323_v36  ;;  %v600_v7 = vmul.f32 %v599_v37, %v1548_v62  ;;  %vm1617_vm0 = vmor %vm662_vm14, %vm663_vm15 }
  0xa8   : > { %v659_v43 = vsub.f32 1.0, %v658_v39  ;;  %v489_v47 = vadd.f32 %v488_v6, %v433_v30  ;;  %v639_v56 = vadd.f32 %v638_v58, %v586_v22  ;;  %v669_v25 = vor.u32 1.1754944e-38, %v668_v61 }
  0xa9   : > { %v837_v44 = vadd.f32 -1.0, %v678_v45  ;;  %v434_v15 = vmin.f32 %v378_v33, %v1330_v41  ;;  %v379_v19 = vmax.f32 %v323_v52, %v1327_v40  ;;  %v653_v36 = vmul.f32 %v652_v51, %v1576_v20 }
  0xaa   : > { %v660_v50 = vmul.f32 %v950_v27, %v659_v43  ;;  %v545_v35 = vadd.f32 %v544_v42, %v489_v47  ;;  %vm667_vm1 = vcmp.eq.f32.partialorder %v666_v34, 8.507059e+37 }
  0xab   : > { %680 = vst [vmem:[%s1498_s17 + $0x1] sm:$0x1] %v837_v44  ;;  %v490_v0 = vmin.f32 %v434_v15, %v1334_v46  ;;  %v435_v40 = vmax.f32 %v379_v19, %v1330_v41 }
  0xac   : > { %v661_v62 = vadd.f32 %v950_v27, %v660_v50  ;;  %v601_v32 = vadd.f32 %v600_v7, %v545_v35 }
  0xad   : > { %v546_v1 = vmin.f32 %v490_v0, %v1337_v48  ;;  %v491_v22 = vmax.f32 %v435_v40, %v1334_v46 }
  0xae   : > { %v665_v21 = vsel %vm1617_vm0, %v950_v27, %v661_v62  ;;  %v654_v2 = vadd.f32 %v653_v36, %v601_v32 }
  0xaf   : > { %v670_v20 = vsel %vm667_vm1, %v669_v25, %v665_v21  ;;  %v602_v41 = vmin.f32 %v546_v1, %v1350_v57  ;;  %v547_v58 = vmax.f32 %v491_v22, %v1337_v48 }
  0xb0   : > { %v671_v3 = vmul.f32 %v670_v20, %v639_v56  ;;  %v681_v5 = vmul.f32 2.0, %v654_v2 }
  0xb1   : > { %v655_v46 = vmin.f32 %v602_v41, %v1456_v59  ;;  %v603_v4 = vmax.f32 %v547_v58, %v1350_v57 }
  0xb2   : > { %vm672_vm2 = vcmp.ne.f32.partialorder %v671_v3, %v671_v3  ;;  %v838_v63 = vadd.f32 -1.0, %v681_v5 }
  0xb3   : > { %v673_v31 = vsel %vm672_vm2, inf, %v671_v3  ;;  %v656_v34 = vmax.f32 %v603_v4, %v1456_v59  ;;  %684 = vst [vmem:[%s1498_s17 + $0xb] sm:$0x1] %v655_v46 }
  0xb4   : > { %674 = vst [vmem:[%s1498_s17 + $0x3] sm:$0x1] %v673_v31 }
  0xb5   : > { %683 = vst [vmem:[%s1498_s17 + $0x2] sm:$0x1] %v838_v63 }
  0xb6   : > { %685 = vst [vmem:[%s1498_s17 + $0xc] sm:$0x1] %v656_v34 }
  0xb7   : > { %1068 = shalt.err (!%p1065_p5)
}
  0xb8   : > { %s1116_s25 = smov 128   ;;  %s1117_s0 = smov 256  }
  0xb9   : > { %s1118_s21 = smov 8  }
  0xba   : > { %851 = dma.vmem_to_hbm [thread:$0]  (%p1185_p11), %s1638_s6, 256, %s701_s20, %s687_s28, %s1116_s25, %s1117_s0, %s1118_s21  }
  0xbb PF: > { %s715_s4 = sand.u32 1, %s1099_s12   ;;  %p864_p7 = pnand %p819_p9, %p1189_p12 }
  0xbc   : > { %s716_s29 = scalar_lea.sflag [#allocation4], %s715_s4 }
  0xbd   : > { %p865_p8 = pneg %p864_p7 }
  0xbf   : > { %1094 = dma.done.wait (%p865_p8), %s716_s29, 256  }
  0xc0   : > { %1096 = vsyncadd (%p865_p8), %s716_s29, 4294967040  ;;  %s1709_s8 = sld [smem:[#allocation12_spill]]  ;;  %p19_p10 = scmp.ge.s32.totalorder %s1164_s18, 4  }
  0xc1   : > { %s1710_s14 = sld [smem:[#allocation13_spill]]  ;;  %s1711_s12 = smov %s1103_s13 }
  0xc2   : > { %s1713_s15 = smov %s1164_s18  ;;  %21 = sbr.rel (!%p19_p10) target bundleno = 10 (0xa), region = 101 }
  0xc6   : > { %s1712_s13 = smov %s1709_s8 }
  0xc7   :  { %722 = vsyncpa [#allocation3], 1 }
  0xc8   :  { %724 = vsyncpa [#allocation3 + $0x1], 1 }
  0xc9   :  { %725 = vsyncpa [#allocation6], 1 }
  0xca   :  { %727 = vsyncpa [#allocation6 + $0x1], 1 }
  0xcb   :  { %728 = vsyncpa [#allocation4], 1 }
  0xcc   :  { %730 = vsyncpa [#allocation4 + $0x1], 1 }

</bundles_post_ra>
